<compile_context>
chip_gen: v5e
topology: v5e:2x2
jax: 0.10.0
libtpu: 0.0.40
codegen_flags: <defaults>
</compile_context>

<pallas_src>
import functools
import math

import jax
import jax.numpy as jnp
from jax.experimental import pallas as pl
from jax.experimental.pallas import tpu as pltpu

_BN_EPS = 1e-5
_MIN_PALLAS_M = 64           # below this, launch/pipeline overhead dominates


def _round_up(x, m):
    return ((x + m - 1) // m) * m


def _m_tiling(M):
    """Pick tm (multiple of 16 for bf16 sublane packing) giving >=2 M-blocks
    whenever possible (v7x megacore balance), with tm <= 256."""
    Mr = _round_up(M, 16)
    nm = max(2, -(-Mr // 256))
    if Mr < 32:
        nm = 1
    tm = _round_up(-(-Mr // nm), 16)
    nm = -(-Mr // tm)
    return tm, nm, nm * tm


# ---------------------------------------------------------------------------
# Pallas kernels
# ---------------------------------------------------------------------------
def _gemm_kernel(*refs, relu, has_residual):
    """Single-sweep GEMM (full K in VMEM) with fused BN(+residual)(+ReLU)
    epilogue; f32 accumulation, bf16 output."""
    if has_residual:
        a_ref, b_ref, s_ref, t_ref, r_ref, o_ref = refs
    else:
        a_ref, b_ref, s_ref, t_ref, o_ref = refs

    acc = jnp.dot(a_ref[...], b_ref[...], preferred_element_type=jnp.float32)
    y = acc * s_ref[...] + t_ref[...]
    if has_residual:
        y = y + r_ref[...].astype(jnp.float32)
    if relu:
        y = jnp.maximum(y, 0.0)
    o_ref[...] = y.astype(o_ref.dtype)


def _dyrelu_kernel(x_ref, c_ref, o_ref):
    """DyReLU-B apply: max(x*a1+b1, x*a2+b2); coefs packed as (1,4,1,C)."""
    x = x_ref[...].astype(jnp.float32)      # (1, tr, C)
    c = c_ref[...]                          # (1, 4, 1, C) f32
    a1 = c[:, 0]                            # (1, 1, C)
    a2 = c[:, 1]
    b1 = c[:, 2]
    b2 = c[:, 3]
    y = jnp.maximum(x * a1 + b1, x * a2 + b2)
    o_ref[...] = y.astype(o_ref.dtype)


# ---------------------------------------------------------------------------
# Fused GEMM wrapper
# ---------------------------------------------------------------------------
def fused_gemm(a, w, scale, shift, residual=None, relu=False,
               out_dtype=jnp.bfloat16):
    """relu?(a @ w * scale + shift (+ residual)).
    a: [M, K] (any float dtype, cast to bf16), w: [K, N] bf16,
    scale/shift: [1, N] f32, residual: optional [M, N]."""
    M, K = a.shape
    K2, Nout = w.shape
    assert K2 == K, (K2, K)

    if M < _MIN_PALLAS_M:
        # Tiny-M GEMM: per perf review, skip Pallas and let XLA fuse it.
        y = jnp.dot(a.astype(jnp.float32), w.astype(jnp.float32)) * scale + shift
        if residual is not None:
            y = y + residual.astype(jnp.float32)
        if relu:
            y = jnp.maximum(y, 0.0)
        return y.astype(out_dtype)

    tm, nm, Mp = _m_tiling(M)
    a_p = a.astype(jnp.bfloat16)
    if Mp != M:
        a_p = jnp.pad(a_p, ((0, Mp - M), (0, 0)))

    args = [a_p, w, scale, shift]
    in_specs = [
        pl.BlockSpec((tm, K), lambda i: (i, 0)),
        pl.BlockSpec((K, Nout), lambda i: (0, 0)),   # VMEM-resident weight
        pl.BlockSpec((1, Nout), lambda i: (0, 0)),
        pl.BlockSpec((1, Nout), lambda i: (0, 0)),
    ]
    has_res = residual is not None
    if has_res:
        r_p = residual.astype(jnp.bfloat16)
        if Mp != M:
            r_p = jnp.pad(r_p, ((0, Mp - M), (0, 0)))
        args.append(r_p)
        in_specs.append(pl.BlockSpec((tm, Nout), lambda i: (i, 0)))

    out = pl.pallas_call(
        functools.partial(_gemm_kernel, relu=relu, has_residual=has_res),
        out_shape=jax.ShapeDtypeStruct((Mp, Nout), out_dtype),
        grid_spec=pltpu.PrefetchScalarGridSpec(
            num_scalar_prefetch=0,
            grid=(nm,),
            in_specs=in_specs,
            out_specs=pl.BlockSpec((tm, Nout), lambda i: (i, 0)),
        ),
        compiler_params=pltpu.CompilerParams(
            dimension_semantics=("parallel",),
            vmem_limit_bytes=32 * 1024 * 1024),
    )(*args)
    return out if Mp == M else out[:M]


def conv2d_bn(x, cp, *, ksize, stride, padding, relu=False, residual=None):
    """Conv2d (no bias) + folded BatchNorm (+residual)(+ReLU) on NHWC input."""
    N, H, W, C = x.shape
    OH = (H + 2 * padding - ksize) // stride + 1
    OW = (W + 2 * padding - ksize) // stride + 1
    xb = x.astype(jnp.bfloat16)
    if padding:
        xb = jnp.pad(xb, ((0, 0), (padding, padding), (padding, padding), (0, 0)))
    if ksize == 1:
        patches = xb[:, ::stride, ::stride, :]
    else:
        # TODO(synk): im2col still materialized by XLA (now bf16, no channel pad);
        # in-kernel tap accumulation would remove this inflation entirely.
        cols = [xb[:, di:di + stride * OH:stride, dj:dj + stride * OW:stride, :]
                for di in range(ksize) for dj in range(ksize)]
        patches = jnp.concatenate(cols, axis=-1)
    patches = patches.reshape(N * OH * OW, ksize * ksize * C)
    res2 = (None if residual is None
            else residual.reshape(N * OH * OW, residual.shape[-1]))
    y = fused_gemm(patches, cp["w"], cp["scale"], cp["shift"],
                   residual=res2, relu=relu)
    return y.reshape(N, OH, OW, cp["w"].shape[1])


def dyrelu_b(x, p):
    """DyReLU-B (k=2) on a bf16 NHWC feature map."""
    N, H, W, C = x.shape
    # theta -> fc1 -> relu -> fc2 are tiny [N, C]-sized ops: keep them in XLA.
    theta = jnp.mean(x.astype(jnp.float32), axis=(1, 2))           # [N, C]
    h = jnp.maximum(theta @ p["w1t"] + p["b1"], 0.0)               # [N, C//4]
    t = h @ p["w2t"] + p["b2"]                                     # [N, 4C]
    t = 2.0 * jax.nn.sigmoid(t) - 1.0
    coefs = t.reshape(N, C, 4) * p["lambdas"] + p["init_v"]        # [N, C, 4]
    # Pack a1,a2,b1,b2 into one coefficient stream: (N, 4, 1, C).
    coef_pack = jnp.transpose(coefs, (0, 2, 1)).reshape(N, 4, 1, C)
    coef_pack = coef_pack.astype(jnp.float32)

    HW = H * W
    tr = min(512, _round_up(HW, 16))
    HWp = _round_up(HW, tr)
    x2 = x.reshape(N, HW, C)
    if HWp != HW:
        x2 = jnp.pad(x2, ((0, 0), (0, HWp - HW), (0, 0)))

    out = pl.pallas_call(
        _dyrelu_kernel,
        out_shape=jax.ShapeDtypeStruct((N, HWp, C), x.dtype),
        grid_spec=pltpu.PrefetchScalarGridSpec(
            num_scalar_prefetch=0,
            grid=(N, HWp // tr),
            in_specs=[pl.BlockSpec((1, tr, C), lambda n, r: (n, r, 0)),
                      pl.BlockSpec((1, 4, 1, C), lambda n, r: (n, 0, 0, 0))],
            out_specs=pl.BlockSpec((1, tr, C), lambda n, r: (n, r, 0)),
        ),
        compiler_params=pltpu.CompilerParams(
            dimension_semantics=("parallel", "parallel")),
    )(x2, coef_pack)
    if HWp != HW:
        out = out[:, :HW]
    return out.reshape(N, H, W, C)


def maxpool_3x3_s2_p1(x):
    """MaxPool2d(3, stride=2, padding=1) as a 9-way max tree (XLA fuses it)."""
    N, H, W, C = x.shape
    OH = (H + 2 - 3) // 2 + 1
    OW = (W + 2 - 3) // 2 + 1
    xp = jnp.pad(x, ((0, 0), (1, 1), (1, 1), (0, 0)), constant_values=-jnp.inf)
    out = None
    for di in range(3):
        for dj in range(3):
            win = xp[:, di:di + 2 * OH:2, dj:dj + 2 * OW:2, :]
            out = win if out is None else jnp.maximum(out, win)
    return out


# ---------------------------------------------------------------------------
# Parameter init (mirrors PyTorch __init__) and one-time prep for the kernels
# ---------------------------------------------------------------------------
def _bn_init(c):
    return dict(gamma=jnp.ones((c,), jnp.float32), beta=jnp.zeros((c,), jnp.float32),
                mean=jnp.zeros((c,), jnp.float32), var=jnp.ones((c,), jnp.float32))


def _conv_init(key, cout, cin, kh, kw):
    fan_out = cout * kh * kw  # kaiming_normal_(mode='fan_out', nonlinearity='relu')
    std = math.sqrt(2.0 / fan_out)
    return std * jax.random.normal(key, (cout, cin, kh, kw), jnp.float32)


def _linear_init(key, out_f, in_f):
    kw, kb = jax.random.split(key)
    bound = 1.0 / math.sqrt(in_f)
    w = jax.random.uniform(kw, (out_f, in_f), jnp.float32, -bound, bound)
    b = jax.random.uniform(kb, (out_f,), jnp.float32, -bound, bound)
    return w, b


def _dyrelu_init(key, c, reduction=4, k=2):
    k1, k2 = jax.random.split(key)
    w1, b1 = _linear_init(k1, c // reduction, c)
    w2, b2 = _linear_init(k2, 2 * k * c, c // reduction)
    return dict(w1=w1, b1=b1, w2=w2, b2=b2,
                lambdas=jnp.array([1.0] * k + [0.5] * k, jnp.float32),
                init_v=jnp.array([1.0] + [0.0] * (2 * k - 1), jnp.float32))


def init_resnet_params(key, layers=(1, 1, 1, 1), num_classes=365):
    keys = iter(jax.random.split(key, 256))
    params = {}
    params["conv1"] = _conv_init(next(keys), 64, 3, 7, 7)
    params["bn1"] = _bn_init(64)
    params["dyrelu"] = _dyrelu_init(next(keys), 64)
    inplanes = 64
    for li, (planes, n_blocks, stride) in enumerate(
            zip((64, 128, 256, 512), layers, (1, 2, 2, 2))):
        blocks = []
        for bi in range(n_blocks):
            s = stride if bi == 0 else 1
            blk = {"conv1": _conv_init(next(keys), planes, inplanes, 3, 3),
                   "bn1": _bn_init(planes),
                   "conv2": _conv_init(next(keys), planes, planes, 3, 3),
                   "bn2": _bn_init(planes)}
            if s != 1 or inplanes != planes:  # BasicBlock.expansion == 1
                blk["down_conv"] = _conv_init(next(keys), planes, inplanes, 1, 1)
                blk["down_bn"] = _bn_init(planes)
            inplanes = planes
            blocks.append(blk)
        params[f"layer{li + 1}"] = blocks
    fc_w, fc_b = _linear_init(next(keys), num_classes, 512)
    params["fc_w"], params["fc_b"] = fc_w, fc_b
    return params


def _prep_conv_bn(w, bn):
    """Fold BN to (scale, shift), reshape weight to (K, Nout) GEMM layout, bf16."""
    cout, cin, kh, kw = w.shape
    w_mat = jnp.transpose(w, (2, 3, 1, 0)).reshape(kh * kw * cin, cout)
    w_mat = w_mat.astype(jnp.bfloat16)
    inv = bn["gamma"] * jax.lax.rsqrt(bn["var"] + _BN_EPS)
    scale = inv.reshape(1, cout).astype(jnp.float32)
    shift = (bn["beta"] - bn["mean"] * inv).reshape(1, cout).astype(jnp.float32)
    return dict(w=w_mat, scale=scale, shift=shift)


def prepare_params(raw):
    """Hoist all per-call constant work (transpose/fold/cast) to init."""
    p = {}
    p["conv1"] = _prep_conv_bn(raw["conv1"], raw["bn1"])
    dy = raw["dyrelu"]
    p["dyrelu"] = dict(w1t=dy["w1"].T, b1=dy["b1"], w2t=dy["w2"].T, b2=dy["b2"],
                       lambdas=dy["lambdas"], init_v=dy["init_v"])
    for li in range(1, 5):
        blocks = []
        for blk in raw[f"layer{li}"]:
            bp = {"conv1": _prep_conv_bn(blk["conv1"], blk["bn1"]),
                  "conv2": _prep_conv_bn(blk["conv2"], blk["bn2"])}
            if "down_conv" in blk:
                bp["down"] = _prep_conv_bn(blk["down_conv"], blk["down_bn"])
            blocks.append(bp)
        p[f"layer{li}"] = blocks
    num_classes = raw["fc_w"].shape[0]
    p["fc"] = dict(w=raw["fc_w"].T.astype(jnp.bfloat16),
                   scale=jnp.ones((1, num_classes), jnp.float32),
                   shift=raw["fc_b"].reshape(1, num_classes).astype(jnp.float32))
    return p


# ---------------------------------------------------------------------------
# Forward pass
# ---------------------------------------------------------------------------
def basic_block(x, blk, stride):
    identity = x
    out = conv2d_bn(x, blk["conv1"], ksize=3, stride=stride, padding=1, relu=True)
    if "down" in blk:
        identity = conv2d_bn(x, blk["down"], ksize=1, stride=stride, padding=0,
                             relu=False)
    # conv2 + bn2 + residual add + ReLU, all in one GEMM epilogue.
    out = conv2d_bn(out, blk["conv2"], ksize=3, stride=1, padding=1, relu=True,
                    residual=identity)
    return out


def resnet_forward(params, x_nchw):
    x = jnp.transpose(x_nchw, (0, 2, 3, 1)).astype(jnp.float32)   # NCHW -> NHWC
    x = conv2d_bn(x, params["conv1"], ksize=7, stride=2, padding=3, relu=False)
    x = dyrelu_b(x, params["dyrelu"])
    x = maxpool_3x3_s2_p1(x)
    strides = (1, 2, 2, 2)
    for li in range(1, 5):
        for bi, blk in enumerate(params[f"layer{li}"]):
            s = strides[li - 1] if bi == 0 else 1
            x = basic_block(x, blk, stride=s)
    feat = jnp.mean(x.astype(jnp.float32), axis=(1, 2))           # AdaptiveAvgPool2d
    fc = params["fc"]
    logits = fused_gemm(feat, fc["w"], fc["scale"], fc["shift"],
                        out_dtype=jnp.float32)
    return logits


if __name__ == "__main__":
    key = jax.random.PRNGKey(0)
    kp, kx = jax.random.split(key)
    raw_params = init_resnet_params(kp, layers=(1, 1, 1, 1), num_classes=365)
    params = prepare_params(raw_params)
    x = jax.random.normal(kx, (2, 3, 32, 32), jnp.float32)        # NCHW like PyTorch
    fwd = jax.jit(resnet_forward)
    logits = jax.block_until_ready(fwd(params, x))
    assert logits.shape == (2, 365), logits.shape
    assert bool(jnp.all(jnp.isfinite(logits)))
    print("KERNEL_OK")
</pallas_src>

<mosaic_0001>
module attributes {stable_mosaic.version = 11 : i64} {
  func.func @_gemm_kernel(%arg0: i32, %arg1: memref<256x147xbf16, #tpu.memory_space<vmem>>, %arg2: memref<147x64xbf16, #tpu.memory_space<vmem>>, %arg3: memref<1x64xf32, #tpu.memory_space<vmem>>, %arg4: memref<1x64xf32, #tpu.memory_space<vmem>>, %arg5: memref<256x64xbf16, #tpu.memory_space<vmem>>) attributes {dimension_semantics = [#tpu.dimension_semantics<parallel>], iteration_bounds = array<i64: 2>, scalar_prefetch = 0 : i64, scratch_operands = 0 : i64, tpu.core_type = #tpu.core_type<tc>, window_params = [{transform_indices = @transform_0, window_bounds = array<i64: 256, 147>}, {pipeline_mode = #tpu.pipeline_mode<synchronous>, transform_indices = @transform_1, window_bounds = array<i64: 147, 64>}, {pipeline_mode = #tpu.pipeline_mode<synchronous>, transform_indices = @transform_2, window_bounds = array<i64: 1, 64>}, {pipeline_mode = #tpu.pipeline_mode<synchronous>, transform_indices = @transform_3, window_bounds = array<i64: 1, 64>}, {transform_indices = @transform_4, window_bounds = array<i64: 256, 64>}]} {
    %c0 = arith.constant 0 : index
    %c0_0 = arith.constant 0 : index
    %0 = vector.load %arg1[%c0, %c0_0] : memref<256x147xbf16, #tpu.memory_space<vmem>>, vector<256x147xbf16>
    %c0_1 = arith.constant 0 : index
    %c0_2 = arith.constant 0 : index
    %1 = vector.load %arg2[%c0_1, %c0_2] : memref<147x64xbf16, #tpu.memory_space<vmem>>, vector<147x64xbf16>
    %cst = arith.constant dense<0.000000e+00> : vector<256x64xf32>
    %2 = tpu.matmul %0, %1, %cst {dimension_numbers = #tpu.dot_dimension_numbers<[1], [0], [0], [1], [0, 0, 1, 1], [], []>} : vector<256x147xbf16>, vector<147x64xbf16>, vector<256x64xf32> -> vector<256x64xf32>
    %c0_3 = arith.constant 0 : index
    %c0_4 = arith.constant 0 : index
    %3 = vector.load %arg3[%c0_3, %c0_4] : memref<1x64xf32, #tpu.memory_space<vmem>>, vector<1x64xf32>
    %4 = vector.broadcast %3 : vector<1x64xf32> to vector<256x64xf32>
    %5 = arith.mulf %2, %4 : vector<256x64xf32>
    %c0_5 = arith.constant 0 : index
    %c0_6 = arith.constant 0 : index
    %6 = vector.load %arg4[%c0_5, %c0_6] : memref<1x64xf32, #tpu.memory_space<vmem>>, vector<1x64xf32>
    %7 = vector.broadcast %6 : vector<1x64xf32> to vector<256x64xf32>
    %8 = arith.addf %5, %7 : vector<256x64xf32>
    %9 = arith.truncf %8 : vector<256x64xf32> to vector<256x64xbf16>
    %c0_7 = arith.constant 0 : index
    %c0_8 = arith.constant 0 : index
    %10 = vector.load %arg5[%c0_7, %c0_8] : memref<256x64xbf16, #tpu.memory_space<vmem>>, vector<256x64xbf16>
    tpu.vector_store %arg5[%c0_7, %c0_8], %9 {strides = array<i32>} : memref<256x64xbf16, #tpu.memory_space<vmem>>, vector<256x64xbf16>,
    return
  }
  func.func @transform_0(%arg0: i32) -> (i32, i32) {
    %c0_i32 = arith.constant 0 : i32
    %c0_i32_0 = arith.constant 0 : i32
    return %arg0, %c0_i32 : i32, i32
  }
  func.func @transform_1(%arg0: i32) -> (i32, i32) {
    %c0_i32 = arith.constant 0 : i32
    %c0_i32_0 = arith.constant 0 : i32
    %c0_i32_1 = arith.constant 0 : i32
    return %c0_i32, %c0_i32_0 : i32, i32
  }
  func.func @transform_2(%arg0: i32) -> (i32, i32) {
    %c0_i32 = arith.constant 0 : i32
    %c0_i32_0 = arith.constant 0 : i32
    %c0_i32_1 = arith.constant 0 : i32
    return %c0_i32, %c0_i32_0 : i32, i32
  }
  func.func @transform_3(%arg0: i32) -> (i32, i32) {
    %c0_i32 = arith.constant 0 : i32
    %c0_i32_0 = arith.constant 0 : i32
    %c0_i32_1 = arith.constant 0 : i32
    return %c0_i32, %c0_i32_0 : i32, i32
  }
  func.func @transform_4(%arg0: i32) -> (i32, i32) {
    %c0_i32 = arith.constant 0 : i32
    %c0_i32_0 = arith.constant 0 : i32
    return %arg0, %c0_i32 : i32, i32
  }
}

module attributes {stable_mosaic.version = 11 : i64} {
  func.func @_dyrelu_kernel(%arg0: i32, %arg1: i32, %arg2: memref<1x256x64xbf16, #tpu.memory_space<vmem>>, %arg3: memref<1x4x1x64xf32, #tpu.memory_space<vmem>>, %arg4: memref<1x256x64xbf16, #tpu.memory_space<vmem>>) attributes {dimension_semantics = [#tpu.dimension_semantics<parallel>, #tpu.dimension_semantics<parallel>], iteration_bounds = array<i64: 2, 1>, scalar_prefetch = 0 : i64, scratch_operands = 0 : i64, tpu.core_type = #tpu.core_type<tc>, window_params = [{transform_indices = @transform_0, window_bounds = array<i64: 1, 256, 64>}, {transform_indices = @transform_1, window_bounds = array<i64: 1, 4, 1, 64>}, {transform_indices = @transform_2, window_bounds = array<i64: 1, 256, 64>}]} {
    %c0 = arith.constant 0 : index
    %c0_0 = arith.constant 0 : index
    %c0_1 = arith.constant 0 : index
    %0 = vector.load %arg2[%c0, %c0_0, %c0_1] : memref<1x256x64xbf16, #tpu.memory_space<vmem>>, vector<1x256x64xbf16>
    %1 = arith.extf %0 : vector<1x256x64xbf16> to vector<1x256x64xf32>
    %c0_2 = arith.constant 0 : index
    %c0_3 = arith.constant 0 : index
    %c0_4 = arith.constant 0 : index
    %c0_5 = arith.constant 0 : index
    %2 = vector.load %arg3[%c0_2, %c0_3, %c0_4, %c0_5] : memref<1x4x1x64xf32, #tpu.memory_space<vmem>>, vector<1x4x1x64xf32>
    %3 = vector.extract_strided_slice %2 {offsets = [0, 0, 0, 0], sizes = [1, 1, 1, 64], strides = [1, 1, 1, 1]} : vector<1x4x1x64xf32> to vector<1x1x1x64xf32>
    %4 = vector.shape_cast %3 : vector<1x1x1x64xf32> to vector<1x1x64xf32>
    %5 = vector.extract_strided_slice %2 {offsets = [0, 1, 0, 0], sizes = [1, 1, 1, 64], strides = [1, 1, 1, 1]} : vector<1x4x1x64xf32> to vector<1x1x1x64xf32>
    %6 = vector.shape_cast %5 : vector<1x1x1x64xf32> to vector<1x1x64xf32>
    %7 = vector.extract_strided_slice %2 {offsets = [0, 2, 0, 0], sizes = [1, 1, 1, 64], strides = [1, 1, 1, 1]} : vector<1x4x1x64xf32> to vector<1x1x1x64xf32>
    %8 = vector.shape_cast %7 : vector<1x1x1x64xf32> to vector<1x1x64xf32>
    %9 = vector.extract_strided_slice %2 {offsets = [0, 3, 0, 0], sizes = [1, 1, 1, 64], strides = [1, 1, 1, 1]} : vector<1x4x1x64xf32> to vector<1x1x1x64xf32>
    %10 = vector.shape_cast %9 : vector<1x1x1x64xf32> to vector<1x1x64xf32>
    %11 = vector.broadcast %4 : vector<1x1x64xf32> to vector<1x256x64xf32>
    %12 = arith.mulf %1, %11 : vector<1x256x64xf32>
    %13 = vector.broadcast %8 : vector<1x1x64xf32> to vector<1x256x64xf32>
    %14 = arith.addf %12, %13 : vector<1x256x64xf32>
    %15 = vector.broadcast %6 : vector<1x1x64xf32> to vector<1x256x64xf32>
    %16 = arith.mulf %1, %15 : vector<1x256x64xf32>
    %17 = vector.broadcast %10 : vector<1x1x64xf32> to vector<1x256x64xf32>
    %18 = arith.addf %16, %17 : vector<1x256x64xf32>
    %19 = arith.maximumf %14, %18 : vector<1x256x64xf32>
    %20 = arith.truncf %19 : vector<1x256x64xf32> to vector<1x256x64xbf16>
    %c0_6 = arith.constant 0 : index
    %c0_7 = arith.constant 0 : index
    %c0_8 = arith.constant 0 : index
    %21 = vector.load %arg4[%c0_6, %c0_7, %c0_8] : memref<1x256x64xbf16, #tpu.memory_space<vmem>>, vector<1x256x64xbf16>
    tpu.vector_store %arg4[%c0_6, %c0_7, %c0_8], %20 {strides = array<i32>} : memref<1x256x64xbf16, #tpu.memory_space<vmem>>, vector<1x256x64xbf16>,
    return
  }
  func.func @transform_0(%arg0: i32, %arg1: i32) -> (i32, i32, i32) {
    %c0_i32 = arith.constant 0 : i32
    %c0_i32_0 = arith.constant 0 : i32
    return %arg0, %arg1, %c0_i32 : i32, i32, i32
  }
  func.func @transform_1(%arg0: i32, %arg1: i32) -> (i32, i32, i32, i32) {
    %c0_i32 = arith.constant 0 : i32
    %c0_i32_0 = arith.constant 0 : i32
    %c0_i32_1 = arith.constant 0 : i32
    %c0_i32_2 = arith.constant 0 : i32
    return %arg0, %c0_i32, %c0_i32_0, %c0_i32_1 : i32, i32, i32, i32
  }
  func.func @transform_2(%arg0: i32, %arg1: i32) -> (i32, i32, i32) {
    %c0_i32 = arith.constant 0 : i32
    %c0_i32_0 = arith.constant 0 : i32
    return %arg0, %arg1, %c0_i32 : i32, i32, i32
  }
}

module attributes {stable_mosaic.version = 11 : i64} {
  func.func @_gemm_kernel(%arg0: i32, %arg1: memref<64x576xbf16, #tpu.memory_space<vmem>>, %arg2: memref<576x64xbf16, #tpu.memory_space<vmem>>, %arg3: memref<1x64xf32, #tpu.memory_space<vmem>>, %arg4: memref<1x64xf32, #tpu.memory_space<vmem>>, %arg5: memref<64x64xbf16, #tpu.memory_space<vmem>>) attributes {dimension_semantics = [#tpu.dimension_semantics<parallel>], iteration_bounds = array<i64: 2>, scalar_prefetch = 0 : i64, scratch_operands = 0 : i64, tpu.core_type = #tpu.core_type<tc>, window_params = [{transform_indices = @transform_0, window_bounds = array<i64: 64, 576>}, {pipeline_mode = #tpu.pipeline_mode<synchronous>, transform_indices = @transform_1, window_bounds = array<i64: 576, 64>}, {pipeline_mode = #tpu.pipeline_mode<synchronous>, transform_indices = @transform_2, window_bounds = array<i64: 1, 64>}, {pipeline_mode = #tpu.pipeline_mode<synchronous>, transform_indices = @transform_3, window_bounds = array<i64: 1, 64>}, {transform_indices = @transform_4, window_bounds = array<i64: 64, 64>}]} {
    %c0 = arith.constant 0 : index
    %c0_0 = arith.constant 0 : index
    %0 = vector.load %arg1[%c0, %c0_0] : memref<64x576xbf16, #tpu.memory_space<vmem>>, vector<64x576xbf16>
    %c0_1 = arith.constant 0 : index
    %c0_2 = arith.constant 0 : index
    %1 = vector.load %arg2[%c0_1, %c0_2] : memref<576x64xbf16, #tpu.memory_space<vmem>>, vector<576x64xbf16>
    %cst = arith.constant dense<0.000000e+00> : vector<64x64xf32>
    %2 = tpu.matmul %0, %1, %cst {dimension_numbers = #tpu.dot_dimension_numbers<[1], [0], [0], [1], [0, 0, 1, 1], [], []>} : vector<64x576xbf16>, vector<576x64xbf16>, vector<64x64xf32> -> vector<64x64xf32>
    %c0_3 = arith.constant 0 : index
    %c0_4 = arith.constant 0 : index
    %3 = vector.load %arg3[%c0_3, %c0_4] : memref<1x64xf32, #tpu.memory_space<vmem>>, vector<1x64xf32>
    %4 = vector.broadcast %3 : vector<1x64xf32> to vector<64x64xf32>
    %5 = arith.mulf %2, %4 : vector<64x64xf32>
    %c0_5 = arith.constant 0 : index
    %c0_6 = arith.constant 0 : index
    %6 = vector.load %arg4[%c0_5, %c0_6] : memref<1x64xf32, #tpu.memory_space<vmem>>, vector<1x64xf32>
    %7 = vector.broadcast %6 : vector<1x64xf32> to vector<64x64xf32>
    %8 = arith.addf %5, %7 : vector<64x64xf32>
    %cst_7 = arith.constant 0.000000e+00 : f32
    %9 = vector.broadcast %cst_7 : f32 to vector<64x64xf32>
    %10 = arith.maximumf %8, %9 : vector<64x64xf32>
    %11 = arith.truncf %10 : vector<64x64xf32> to vector<64x64xbf16>
    %c0_8 = arith.constant 0 : index
    %c0_9 = arith.constant 0 : index
    %12 = vector.load %arg5[%c0_8, %c0_9] : memref<64x64xbf16, #tpu.memory_space<vmem>>, vector<64x64xbf16>
    tpu.vector_store %arg5[%c0_8, %c0_9], %11 {strides = array<i32>} : memref<64x64xbf16, #tpu.memory_space<vmem>>, vector<64x64xbf16>,
    return
  }
  func.func @transform_0(%arg0: i32) -> (i32, i32) {
    %c0_i32 = arith.constant 0 : i32
    %c0_i32_0 = arith.constant 0 : i32
    return %arg0, %c0_i32 : i32, i32
  }
  func.func @transform_1(%arg0: i32) -> (i32, i32) {
    %c0_i32 = arith.constant 0 : i32
    %c0_i32_0 = arith.constant 0 : i32
    %c0_i32_1 = arith.constant 0 : i32
    return %c0_i32, %c0_i32_0 : i32, i32
  }
  func.func @transform_2(%arg0: i32) -> (i32, i32) {
    %c0_i32 = arith.constant 0 : i32
    %c0_i32_0 = arith.constant 0 : i32
    %c0_i32_1 = arith.constant 0 : i32
    return %c0_i32, %c0_i32_0 : i32, i32
  }
  func.func @transform_3(%arg0: i32) -> (i32, i32) {
    %c0_i32 = arith.constant 0 : i32
    %c0_i32_0 = arith.constant 0 : i32
    %c0_i32_1 = arith.constant 0 : i32
    return %c0_i32, %c0_i32_0 : i32, i32
  }
  func.func @transform_4(%arg0: i32) -> (i32, i32) {
    %c0_i32 = arith.constant 0 : i32
    %c0_i32_0 = arith.constant 0 : i32
    return %arg0, %c0_i32 : i32, i32
  }
}

module attributes {stable_mosaic.version = 11 : i64} {
  func.func @_gemm_kernel(%arg0: i32, %arg1: memref<64x576xbf16, #tpu.memory_space<vmem>>, %arg2: memref<576x64xbf16, #tpu.memory_space<vmem>>, %arg3: memref<1x64xf32, #tpu.memory_space<vmem>>, %arg4: memref<1x64xf32, #tpu.memory_space<vmem>>, %arg5: memref<64x64xbf16, #tpu.memory_space<vmem>>, %arg6: memref<64x64xbf16, #tpu.memory_space<vmem>>) attributes {dimension_semantics = [#tpu.dimension_semantics<parallel>], iteration_bounds = array<i64: 2>, scalar_prefetch = 0 : i64, scratch_operands = 0 : i64, tpu.core_type = #tpu.core_type<tc>, window_params = [{transform_indices = @transform_0, window_bounds = array<i64: 64, 576>}, {pipeline_mode = #tpu.pipeline_mode<synchronous>, transform_indices = @transform_1, window_bounds = array<i64: 576, 64>}, {pipeline_mode = #tpu.pipeline_mode<synchronous>, transform_indices = @transform_2, window_bounds = array<i64: 1, 64>}, {pipeline_mode = #tpu.pipeline_mode<synchronous>, transform_indices = @transform_3, window_bounds = array<i64: 1, 64>}, {transform_indices = @transform_4, window_bounds = array<i64: 64, 64>}, {transform_indices = @transform_5, window_bounds = array<i64: 64, 64>}]} {
    %c0 = arith.constant 0 : index
    %c0_0 = arith.constant 0 : index
    %0 = vector.load %arg1[%c0, %c0_0] : memref<64x576xbf16, #tpu.memory_space<vmem>>, vector<64x576xbf16>
    %c0_1 = arith.constant 0 : index
    %c0_2 = arith.constant 0 : index
    %1 = vector.load %arg2[%c0_1, %c0_2] : memref<576x64xbf16, #tpu.memory_space<vmem>>, vector<576x64xbf16>
    %cst = arith.constant dense<0.000000e+00> : vector<64x64xf32>
    %2 = tpu.matmul %0, %1, %cst {dimension_numbers = #tpu.dot_dimension_numbers<[1], [0], [0], [1], [0, 0, 1, 1], [], []>} : vector<64x576xbf16>, vector<576x64xbf16>, vector<64x64xf32> -> vector<64x64xf32>
    %c0_3 = arith.constant 0 : index
    %c0_4 = arith.constant 0 : index
    %3 = vector.load %arg3[%c0_3, %c0_4] : memref<1x64xf32, #tpu.memory_space<vmem>>, vector<1x64xf32>
    %4 = vector.broadcast %3 : vector<1x64xf32> to vector<64x64xf32>
    %5 = arith.mulf %2, %4 : vector<64x64xf32>
    %c0_5 = arith.constant 0 : index
    %c0_6 = arith.constant 0 : index
    %6 = vector.load %arg4[%c0_5, %c0_6] : memref<1x64xf32, #tpu.memory_space<vmem>>, vector<1x64xf32>
    %7 = vector.broadcast %6 : vector<1x64xf32> to vector<64x64xf32>
    %8 = arith.addf %5, %7 : vector<64x64xf32>
    %c0_7 = arith.constant 0 : index
    %c0_8 = arith.constant 0 : index
    %9 = vector.load %arg5[%c0_7, %c0_8] : memref<64x64xbf16, #tpu.memory_space<vmem>>, vector<64x64xbf16>
    %10 = arith.extf %9 : vector<64x64xbf16> to vector<64x64xf32>
    %11 = arith.addf %8, %10 : vector<64x64xf32>
    %cst_9 = arith.constant 0.000000e+00 : f32
    %12 = vector.broadcast %cst_9 : f32 to vector<64x64xf32>
    %13 = arith.maximumf %11, %12 : vector<64x64xf32>
    %14 = arith.truncf %13 : vector<64x64xf32> to vector<64x64xbf16>
    %c0_10 = arith.constant 0 : index
    %c0_11 = arith.constant 0 : index
    %15 = vector.load %arg6[%c0_10, %c0_11] : memref<64x64xbf16, #tpu.memory_space<vmem>>, vector<64x64xbf16>
    tpu.vector_store %arg6[%c0_10, %c0_11], %14 {strides = array<i32>} : memref<64x64xbf16, #tpu.memory_space<vmem>>, vector<64x64xbf16>,
    return
  }
  func.func @transform_0(%arg0: i32) -> (i32, i32) {
    %c0_i32 = arith.constant 0 : i32
    %c0_i32_0 = arith.constant 0 : i32
    return %arg0, %c0_i32 : i32, i32
  }
  func.func @transform_1(%arg0: i32) -> (i32, i32) {
    %c0_i32 = arith.constant 0 : i32
    %c0_i32_0 = arith.constant 0 : i32
    %c0_i32_1 = arith.constant 0 : i32
    return %c0_i32, %c0_i32_0 : i32, i32
  }
  func.func @transform_2(%arg0: i32) -> (i32, i32) {
    %c0_i32 = arith.constant 0 : i32
    %c0_i32_0 = arith.constant 0 : i32
    %c0_i32_1 = arith.constant 0 : i32
    return %c0_i32, %c0_i32_0 : i32, i32
  }
  func.func @transform_3(%arg0: i32) -> (i32, i32) {
    %c0_i32 = arith.constant 0 : i32
    %c0_i32_0 = arith.constant 0 : i32
    %c0_i32_1 = arith.constant 0 : i32
    return %c0_i32, %c0_i32_0 : i32, i32
  }
  func.func @transform_4(%arg0: i32) -> (i32, i32) {
    %c0_i32 = arith.constant 0 : i32
    %c0_i32_0 = arith.constant 0 : i32
    return %arg0, %c0_i32 : i32, i32
  }
  func.func @transform_5(%arg0: i32) -> (i32, i32) {
    %c0_i32 = arith.constant 0 : i32
    %c0_i32_0 = arith.constant 0 : i32
    return %arg0, %c0_i32 : i32, i32
  }
}

</mosaic_0001>

<bundles_post_ra>
// kernel: resnet_forward.4
= control target key start
LH: loop header
LB: loop body
LE: loop exit
PB: predicated region body
PF: predicated region fallthrough
CT: control target
= control target key end

     0   :  { %s1173_s15 = smov 0   ;;  %s1452_s0 = inlined_call_operand.vmem [shape: bf16[512,147], index: 0, kind: input, shape index: {}]   ;;  %s1453_s1 = inlined_call_operand.vmem [shape: bf16[147,64], index: 1, kind: input, shape index: {}]   ;;  %s1454_s2 = inlined_call_operand.vmem [shape: f32[1,64], index: 2, kind: input, shape index: {}]   ;;  %s1455_s3 = inlined_call_operand.vmem [shape: f32[1,64], index: 3, kind: input, shape index: {}]   ;;  %s1456_s4 = inlined_call_operand.vmem [shape: bf16[512,64], index: 4, kind: output, shape index: {}]  }
   0x1 LB: > { %s884_s16 = sadd.s32 4294967295, %s1145_s15   ;;  %p888_p0 = scmp.ge.s32.totalorder %s1145_s15, 1  ;;  %s1145_s15 = sphi %s1173_s15, %s14_s15  }
   0x2   : > { %p164_p1 = scmp.lt.s32.totalorder %s1145_s15, 3 }
   0x4   : > { %p165_p2 = pnand %p888_p0, %p164_p1 }
   0x5   : > { %s889_s21 = sshll.u32 (!%p165_p2), %s884_s16, 5 }
   0x6   : > { %168 = sbr.rel (%p165_p2) target bundleno = 304 (0x130), region = 36  ;;  %p192_p3 = scmp.lt.s32.totalorder (!%p165_p2), %s889_s21, 63 }
   0xb   : > { %v1116_v0 = vld [vmem:[%s1453_s1 + $0x38] sm:$0xff]  ;;  %v255_v1 = vld [vmem:[%s1453_s1 + $0x48] sm:$0x3]  ;;  %vm506_vm0 = vcmask 1040384   ;;  %vm507_vm1 = vcmask 1041408   ;;  %v1115_v3 = vld [vmem:[%s1453_s1 + $0x30] sm:$0xff] }
   0xc   : > { %v437_v2 = vunpack.c.l.b16 %v255_v1  ;;  %513 = vmatpush.bf16.msra.mxu0 %v1116_v0  ;;  %1118 = vmatpush.bf16.msra.mxu2 %v1116_v0  ;;  %v1147_v4 = vmov 65535   ;;  %s1458_s21 = smov (!%p192_p3, %s889_s21), 63  ;;  %v1114_v9 = vld [vmem:[%s1453_s1 + $0x28] sm:$0xff]  ;;  %v1117_v10 = vld [vmem:[%s1453_s1 + $0x40] sm:$0xff]  ;;  %vm457_vm2 = vcmask 154624   ;;  %v1112_v18 = vld [vmem:[%s1453_s1 + $0x18] sm:$0xff] }
   0xd   : > { %v508_v5 = vsel %vm506_vm0, 4294967295, %v1147_v4  ;;  %s1076_s26 = sshll.u32 %s1458_s21, 3  ;;  %v1113_v14 = vld [vmem:[%s1453_s1 + $0x20] sm:$0xff]  ;;  %v1111_v19 = vld [vmem:[%s1453_s1 + $0x10] sm:$0xff]  ;;  %v1110_v20 = vld [vmem:[%s1453_s1 + $0x8] sm:$0xff]  ;;  %s893_s22 = sshll.u32 %s1458_s21, 2 }
   0xe   : > { %v447_v6 = vpack.c.b16 %v437_v2, %v437_v2  ;;  %v509_v7 = vsel %vm507_vm1, %v508_v5, 0  ;;  %s1202_s5 = scalar_lea.vmem %s1452_s0, %s1076_s26  ;;  %v1109_v26 = vld [vmem:[%s1453_s1] sm:$0xff]  ;;  %s1315_s25 = scalar_lea.vmem %s1456_s4, %s893_s22  ;;  %vm795_vm3 = vcmask 519168  }
   0xf   : > { %v1077_v11 = vld [vmem:[%s1202_s5 + $0x4] sm:$0xf]  ;;  %v898_v12 = vld [vmem:[%s1202_s5 + $0x8] sm:$0xf0]  ;;  %v1095_v15 = vld [vmem:[%s1202_s5 + $0x94] sm:$0xf] }
  0x10   : > { %v511_v8 = vand.u32 %v509_v7, %v447_v6  ;;  %514 = vmatpush.bf16.msra.mxu0 %v1115_v3  ;;  %1119 = vmatpush.bf16.msra.mxu2 %v1115_v3  ;;  %v901_v13 = vor.u32 %v1077_v11, %v898_v12  ;;  %v970_v16 = vld [vmem:[%s1202_s5 + $0x98] sm:$0xf0]  ;;  %v1079_v21 = vld [vmem:[%s1202_s5 + $0x14] sm:$0xf]  ;;  %v1097_v23 = vld [vmem:[%s1202_s5 + $0xa4] sm:$0xf] }
  0x11   : > { %v973_v17 = vor.u32 %v1095_v15, %v970_v16  ;;  %v906_v22 = vld [vmem:[%s1202_s5 + $0x18] sm:$0xf0]  ;;  %v978_v24 = vld [vmem:[%s1202_s5 + $0xa8] sm:$0xf0]  ;;  %v896_v27 = vld [vmem:[%s1202_s5] sm:$0xf] }
  0x12   : > { %608 = vmatpush.bf16.msra.mxu1 %v511_v8  ;;  %1126 = vmatpush.bf16.msra.mxu3 %v511_v8  ;;  %v909_v25 = vor.u32 %v1079_v21, %v906_v22  ;;  %v1078_v28 = vld [vmem:[%s1202_s5 + $0x4] sm:$0xf0]  ;;  %v960_v29 = vld [vmem:[%s1202_s5 + $0x80] sm:$0xf]  ;;  %v981_v31 = vor.u32 %v1097_v23, %v978_v24  ;;  %v1081_v34 = vld [vmem:[%s1202_s5 + $0x24] sm:$0xf] }
  0x13   : > { %v1094_v30 = vld [vmem:[%s1202_s5 + $0x84] sm:$0xf0]  ;;  %v897_v32 = vor.u32 %v1078_v28, %v896_v27  ;;  %v914_v35 = vld [vmem:[%s1202_s5 + $0x28] sm:$0xf0]  ;;  %v1099_v36 = vld [vmem:[%s1202_s5 + $0xb4] sm:$0xf] }
  0x14   : > { %515 = vmatpush.bf16.msra.mxu0 %v1114_v9  ;;  %1120 = vmatpush.bf16.msra.mxu2 %v1114_v9  ;;  %v961_v33 = vor.u32 %v1094_v30, %v960_v29  ;;  %v986_v37 = vld [vmem:[%s1202_s5 + $0xb8] sm:$0xf0]  ;;  %v917_v38 = vor.u32 %v1081_v34, %v914_v35  ;;  %v904_v39 = vld [vmem:[%s1202_s5 + $0x10] sm:$0xf]  ;;  %v1080_v40 = vld [vmem:[%s1202_s5 + $0x14] sm:$0xf0] }
  0x15   : > { %v968_v41 = vld [vmem:[%s1202_s5 + $0x90] sm:$0xf]  ;;  %v1096_v42 = vld [vmem:[%s1202_s5 + $0x94] sm:$0xf0]  ;;  %v989_v43 = vor.u32 %v1099_v36, %v986_v37  ;;  %v905_v44 = vor.u32 %v1080_v40, %v904_v39  ;;  %v1083_v46 = vld [vmem:[%s1202_s5 + $0x34] sm:$0xf] }
  0x16   : > { %609 = vmatpush.bf16.msra.mxu1 %v1117_v10  ;;  %1127 = vmatpush.bf16.msra.mxu3 %v1117_v10  ;;  %v969_v45 = vor.u32 %v1096_v42, %v968_v41  ;;  %v922_v47 = vld [vmem:[%s1202_s5 + $0x38] sm:$0xf0]  ;;  %v1101_v48 = vld [vmem:[%s1202_s5 + $0xc4] sm:$0xf]  ;;  %v994_v49 = vld [vmem:[%s1202_s5 + $0xc8] sm:$0xf0] }
  0x17   : > { %v925_v50 = vor.u32 %v1083_v46, %v922_v47  ;;  %v912_v51 = vld [vmem:[%s1202_s5 + $0x20] sm:$0xf]  ;;  %v1082_v52 = vld [vmem:[%s1202_s5 + $0x24] sm:$0xf0]  ;;  %v997_v55 = vor.u32 %v1101_v48, %v994_v49  ;;  %v1085_v58 = vld [vmem:[%s1202_s5 + $0x44] sm:$0xf] }
  0x18   : > { %516 = vmatpush.bf16.msra.mxu0 %v1113_v14  ;;  %1121 = vmatpush.bf16.msra.mxu2 %v1113_v14  ;;  %v976_v53 = vld [vmem:[%s1202_s5 + $0xa0] sm:$0xf]  ;;  %v1098_v54 = vld [vmem:[%s1202_s5 + $0xa4] sm:$0xf0]  ;;  %v913_v56 = vor.u32 %v1082_v52, %v912_v51  ;;  %v930_v59 = vld [vmem:[%s1202_s5 + $0x48] sm:$0xf0] }
  0x19   : > { %1058 = vmatmul.msk.bf16.vlgmr.msra.gmra.mxu1 %vm457_vm2, %v901_v13  ;;  %1067 = vmatmul.msk.bf16.vlgmr.msra.gmra.mxu3 %vm457_vm2, %v973_v17  ;;  %v977_v57 = vor.u32 %v1098_v54, %v976_v53  ;;  %v1103_v60 = vld [vmem:[%s1202_s5 + $0xd4] sm:$0xf]  ;;  %v1002_v61 = vld [vmem:[%s1202_s5 + $0xd8] sm:$0xf0]  ;;  %v933_v62 = vor.u32 %v1085_v58, %v930_v59  ;;  %v920_v63 = vld [vmem:[%s1202_s5 + $0x30] sm:$0xf] }
  0x1a   : > { %v1084_v0 = vld [vmem:[%s1202_s5 + $0x34] sm:$0xf0]  ;;  %v984_v1 = vld [vmem:[%s1202_s5 + $0xb0] sm:$0xf]  ;;  %v1005_v3 = vor.u32 %v1103_v60, %v1002_v61  ;;  %v1087_v6 = vld [vmem:[%s1202_s5 + $0x54] sm:$0xf] }
  0x1b   : > { %v1100_v2 = vld [vmem:[%s1202_s5 + $0xb4] sm:$0xf0]  ;;  %v921_v4 = vor.u32 %v1084_v0, %v920_v63  ;;  %v938_v7 = vld [vmem:[%s1202_s5 + $0x58] sm:$0xf0]  ;;  %v1105_v8 = vld [vmem:[%s1202_s5 + $0xe4] sm:$0xf] }
  0x1c   : > { %517 = vmatpush.bf16.msra.mxu0 %v1112_v18  ;;  %1122 = vmatpush.bf16.msra.mxu2 %v1112_v18  ;;  %v985_v5 = vor.u32 %v1100_v2, %v984_v1  ;;  %v1010_v9 = vld [vmem:[%s1202_s5 + $0xe8] sm:$0xf0]  ;;  %v941_v10 = vor.u32 %v1087_v6, %v938_v7  ;;  %v928_v11 = vld [vmem:[%s1202_s5 + $0x40] sm:$0xf]  ;;  %v1086_v12 = vld [vmem:[%s1202_s5 + $0x44] sm:$0xf0] }
  0x1d   : > { %v992_v13 = vld [vmem:[%s1202_s5 + $0xc0] sm:$0xf]  ;;  %v1102_v14 = vld [vmem:[%s1202_s5 + $0xc4] sm:$0xf0]  ;;  %v1013_v15 = vor.u32 %v1105_v8, %v1010_v9  ;;  %v929_v16 = vor.u32 %v1086_v12, %v928_v11  ;;  %v1089_v18 = vld [vmem:[%s1202_s5 + $0x64] sm:$0xf] }
  0x1e   : > { %v993_v17 = vor.u32 %v1102_v14, %v992_v13  ;;  %v1018_v21 = vld [vmem:[%s1202_s5 + $0xf8] sm:$0xf0]  ;;  %v936_v23 = vld [vmem:[%s1202_s5 + $0x50] sm:$0xf]  ;;  %v1088_v24 = vld [vmem:[%s1202_s5 + $0x54] sm:$0xf0] }
  0x1f   : > { %v937_v28 = vor.u32 %v1088_v24, %v936_v23  ;;  %v1091_v30 = vld [vmem:[%s1202_s5 + $0x74] sm:$0xf]  ;;  %v1090_v34 = vld [vmem:[%s1202_s5 + $0x64] sm:$0xf0]  ;;  %v1008_v35 = vld [vmem:[%s1202_s5 + $0xe0] sm:$0xf] }
  0x20   : > { %518 = vmatpush.bf16.msra.mxu0 %v1111_v19  ;;  %1123 = vmatpush.bf16.msra.mxu2 %v1111_v19  ;;  %v946_v19 = vld [vmem:[%s1202_s5 + $0x68] sm:$0xf0]  ;;  %v1106_v36 = vld [vmem:[%s1202_s5 + $0xe4] sm:$0xf0]  ;;  %v1093_v39 = vld [vmem:[%s1202_s5 + $0x84] sm:$0xf] }
  0x21   : > { %v949_v22 = vor.u32 %v1089_v18, %v946_v19  ;;  %v962_v40 = vld [vmem:[%s1202_s5 + $0x88] sm:$0xf0]  ;;  %v952_v42 = vld [vmem:[%s1202_s5 + $0x70] sm:$0xf]  ;;  %v1108_v46 = vld [vmem:[%s1202_s5 + $0xf4] sm:$0xf0] }
  0x22   : > { %v965_v41 = vor.u32 %v1093_v39, %v962_v40  ;;  %v1302_v52 = vld [vmem:[%s1454_s2] ss:$0 sm:$0xff] }
  0x24   : > { %519 = vmatpush.bf16.msra.mxu0 %v1110_v20  ;;  %1124 = vmatpush.bf16.msra.mxu2 %v1110_v20  ;;  %v1107_v20 = vld [vmem:[%s1202_s5 + $0xf4] sm:$0xf] }
  0x25   : > { %v1021_v27 = vor.u32 %v1107_v20, %v1018_v21 }
  0x28   : > { %520 = vmatpush.bf16.msra.mxu0 %v1109_v26  ;;  %1125 = vmatpush.bf16.msra.mxu2 %v1109_v26  ;;  %v1104_v26 = vld [vmem:[%s1202_s5 + $0xd4] sm:$0xf0] }
  0x29   : > { %1059 = vmatmul.msk.bf16.gmra.mxu1 %vm457_vm2, %v909_v25  ;;  %1068 = vmatmul.msk.bf16.gmra.mxu3 %vm457_vm2, %v981_v31  ;;  %v1000_v25 = vld [vmem:[%s1202_s5 + $0xd0] sm:$0xf]  ;;  %v954_v31 = vld [vmem:[%s1202_s5 + $0x78] sm:$0xf0] }
  0x2a   : > { %v1001_v29 = vor.u32 %v1104_v26, %v1000_v25 }
  0x2b   : > { %521 = vmatmul.bf16.vlgmr.msra.gmra.mxu0 %v897_v32  ;;  %561 = vmatmul.bf16.vlgmr.msra.gmra.mxu2 %v961_v33  ;;  %v957_v32 = vor.u32 %v1091_v30, %v954_v31  ;;  %v944_v33 = vld [vmem:[%s1202_s5 + $0x60] sm:$0xf] }
  0x2c   : > { %v945_v37 = vor.u32 %v1090_v34, %v944_v33 }
  0x39   : > { %1060 = vmatmul.msk.bf16.gmra.mxu1 %vm457_vm2, %v917_v38  ;;  %1069 = vmatmul.msk.bf16.gmra.mxu3 %vm457_vm2, %v989_v43  ;;  %v1009_v38 = vor.u32 %v1106_v36, %v1008_v35  ;;  %v1092_v43 = vld [vmem:[%s1202_s5 + $0x74] sm:$0xf0] }
  0x3a   : > { %v953_v47 = vor.u32 %v1092_v43, %v952_v42 }
  0x3b   : > { %526 = vmatmul.bf16.gmra.mxu0 %v905_v44  ;;  %566 = vmatmul.bf16.gmra.mxu2 %v969_v45  ;;  %v1016_v45 = vld [vmem:[%s1202_s5 + $0xf0] sm:$0xf] }
  0x3c   : > { %v1017_v48 = vor.u32 %v1108_v46, %v1016_v45 }
  0x49   : > { %1061 = vmatmul.msk.bf16.gmra.mxu1 %vm457_vm2, %v925_v50  ;;  %1070 = vmatmul.msk.bf16.gmra.mxu3 %vm457_vm2, %v997_v55  ;;  %v1307_v55 = vld [vmem:[%s1455_s3] ss:$0 sm:$0xff] }
  0x4b   : > { %531 = vmatmul.bf16.gmra.mxu0 %v913_v56  ;;  %571 = vmatmul.bf16.gmra.mxu2 %v977_v57 }
  0x59   : > { %1062 = vmatmul.msk.bf16.gmra.mxu1 %vm457_vm2, %v933_v62  ;;  %1071 = vmatmul.msk.bf16.gmra.mxu3 %vm457_vm2, %v1005_v3 }
  0x5b   : > { %536 = vmatmul.bf16.gmra.mxu0 %v921_v4  ;;  %576 = vmatmul.bf16.gmra.mxu2 %v985_v5 }
  0x69   : > { %1063 = vmatmul.msk.bf16.gmra.mxu1 %vm457_vm2, %v941_v10  ;;  %1072 = vmatmul.msk.bf16.gmra.mxu3 %vm457_vm2, %v1013_v15 }
  0x6b   : > { %541 = vmatmul.bf16.gmra.mxu0 %v929_v16  ;;  %581 = vmatmul.bf16.gmra.mxu2 %v993_v17 }
  0x79   : > { %1064 = vmatmul.msk.bf16.gmra.mxu1 %vm457_vm2, %v949_v22  ;;  %1073 = vmatmul.msk.bf16.gmra.mxu3 %vm457_vm2, %v1021_v27 }
  0x7b   : > { %546 = vmatmul.bf16.gmra.mxu0 %v937_v28  ;;  %586 = vmatmul.bf16.gmra.mxu2 %v1001_v29 }
  0x89   : > { %1065 = vmatmul.msk.bf16.gmra.mxu1 %vm457_vm2, %v957_v32 }
  0x8b   : > { %551 = vmatmul.bf16.gmra.mxu0 %v945_v37  ;;  %591 = vmatmul.bf16.gmra.mxu2 %v1009_v38 }
  0x96   : > { %v611_v44 = vpop.f32.mrf.mxu1 }
  0x99   : > { %1066 = vmatmul.msk.bf16.gmra.mxu1 %vm457_vm2, %v965_v41 }
  0x9b   : > { %556 = vmatmul.bf16.gmra.mxu0 %v953_v47  ;;  %596 = vmatmul.bf16.gmra.mxu2 %v1017_v48 }
  0x9c   : > { %v656_v51 = vpop.f32.mrf.mxu3 }
  0x9e   : > { %v613_v49 = vpop.f32.mrf.mxu1 }
  0xa4   : > { %v658_v61 = vpop.f32.mrf.mxu3 }
  0xa6   : > { %v616_v50 = vpop.f32.mrf.mxu1 }
  0xa8   : > { %v522_v53 = vpop.f32.mrf.mxu0 }
  0xa9   : > { %v612_v54 = vadd.f32 %v611_v44, %v522_v53 }
  0xab   : > { %v695_v56 = vmul.f32 %v1302_v52, %v612_v54 }
  0xac   : > { %v661_v7 = vpop.f32.mrf.mxu3 }
  0xad   : > { %v731_v57 = vadd.f32 %v1307_v55, %v695_v56 }
  0xae   : > { %v618_v58 = vpop.f32.mrf.mxu1  ;;  %v1317_v60 = vpop.f32.mrf.mxu2 }
  0xaf   : > { %v763_v59 = vpack.c.bf16 %v731_v57, %v731_v57 }
  0xb0   : > { %v524_v62 = vpop.f32.mrf.mxu0 }
  0xb1   : > { %796 = vst.msk [vmem:[%s1315_s25] sm:$0xf] %vm795_vm3, %v763_v59  ;;  %v614_v63 = vadd.f32 %v613_v49, %v524_v62 }
  0xb3   : > { %v696_v0 = vmul.f32 %v1302_v52, %v614_v63 }
  0xb4   : > { %v663_v18 = vpop.f32.mrf.mxu3 }
  0xb5   : > { %v732_v1 = vadd.f32 %v1307_v55, %v696_v0 }
  0xb6   : > { %v621_v2 = vpop.f32.mrf.mxu1  ;;  %v1323_v4 = vpop.f32.mrf.mxu2 }
  0xb7   : > { %v764_v3 = vpack.c.bf16 %v732_v1, %v732_v1 }
  0xb8   : > { %v527_v5 = vpop.f32.mrf.mxu0 }
  0xb9   : > { %797 = vst.msk [vmem:[%s1315_s25 + $0x4] sm:$0xf] %vm795_vm3, %v764_v3  ;;  %v617_v6 = vadd.f32 %v616_v50, %v527_v5 }
  0xbb   : > { %v697_v8 = vmul.f32 %v1302_v52, %v617_v6 }
  0xbc   : > { %v666_v33 = vpop.f32.mrf.mxu3 }
  0xbd   : > { %v733_v9 = vadd.f32 %v1307_v55, %v697_v8 }
  0xbe   : > { %v623_v10 = vpop.f32.mrf.mxu1  ;;  %v567_v12 = vpop.f32.mrf.mxu2 }
  0xbf   : > { %v765_v11 = vpack.c.bf16 %v733_v9, %v733_v9  ;;  %v657_v13 = vadd.f32 %v656_v51, %v567_v12 }
  0xc0   : > { %v529_v14 = vpop.f32.mrf.mxu0 }
  0xc1   : > { %798 = vst.msk [vmem:[%s1315_s25 + $0x8] sm:$0xf] %vm795_vm3, %v765_v11  ;;  %v619_v15 = vadd.f32 %v618_v58, %v529_v14  ;;  %v713_v16 = vmul.f32 %v1302_v52, %v657_v13 }
  0xc3   : > { %v698_v17 = vmul.f32 %v1302_v52, %v619_v15  ;;  %v749_v19 = vadd.f32 %v1307_v55, %v713_v16 }
  0xc4   : > { %v668_v48 = vpop.f32.mrf.mxu3 }
  0xc5   : > { %v734_v20 = vadd.f32 %v1307_v55, %v698_v17  ;;  %v781_v22 = vpack.c.bf16 %v749_v19, %v749_v19 }
  0xc6   : > { %v626_v21 = vpop.f32.mrf.mxu1  ;;  %v569_v24 = vpop.f32.mrf.mxu2 }
  0xc7   : > { %v766_v23 = vpack.c.bf16 %v734_v20, %v734_v20  ;;  %814 = vst.msk [vmem:[%s1315_s25 + $0x48] sm:$0xf] %vm795_vm3, %v781_v22  ;;  %v659_v25 = vadd.f32 %v658_v61, %v569_v24 }
  0xc8   : > { %v532_v26 = vpop.f32.mrf.mxu0 }
  0xc9   : > { %799 = vst.msk [vmem:[%s1315_s25 + $0xc] sm:$0xf] %vm795_vm3, %v766_v23  ;;  %v622_v27 = vadd.f32 %v621_v2, %v532_v26  ;;  %v714_v28 = vmul.f32 %v1302_v52, %v659_v25 }
  0xcb   : > { %v699_v29 = vmul.f32 %v1302_v52, %v622_v27  ;;  %v750_v30 = vadd.f32 %v1307_v55, %v714_v28 }
  0xcc   : > { %v671_v2 = vpop.f32.mrf.mxu3 }
  0xcd   : > { %v735_v31 = vadd.f32 %v1307_v55, %v699_v29  ;;  %v782_v34 = vpack.c.bf16 %v750_v30, %v750_v30 }
  0xce   : > { %v628_v32 = vpop.f32.mrf.mxu1  ;;  %v572_v36 = vpop.f32.mrf.mxu2 }
  0xcf   : > { %v767_v35 = vpack.c.bf16 %v735_v31, %v735_v31  ;;  %815 = vst.msk [vmem:[%s1315_s25 + $0x4c] sm:$0xf] %vm795_vm3, %v782_v34  ;;  %v662_v37 = vadd.f32 %v661_v7, %v572_v36 }
  0xd0   : > { %v534_v38 = vpop.f32.mrf.mxu0 }
  0xd1   : > { %800 = vst.msk [vmem:[%s1315_s25 + $0x10] sm:$0xf] %vm795_vm3, %v767_v35  ;;  %v624_v39 = vadd.f32 %v623_v10, %v534_v38  ;;  %v715_v40 = vmul.f32 %v1302_v52, %v662_v37 }
  0xd3   : > { %v700_v41 = vmul.f32 %v1302_v52, %v624_v39  ;;  %v751_v42 = vadd.f32 %v1307_v55, %v715_v40 }
  0xd4   : > { %v673_v17 = vpop.f32.mrf.mxu3 }
  0xd5   : > { %v736_v43 = vadd.f32 %v1307_v55, %v700_v41  ;;  %v783_v45 = vpack.c.bf16 %v751_v42, %v751_v42 }
  0xd6   : > { %v631_v44 = vpop.f32.mrf.mxu1  ;;  %v574_v47 = vpop.f32.mrf.mxu2 }
  0xd7   : > { %v768_v46 = vpack.c.bf16 %v736_v43, %v736_v43  ;;  %816 = vst.msk [vmem:[%s1315_s25 + $0x50] sm:$0xf] %vm795_vm3, %v783_v45  ;;  %v664_v49 = vadd.f32 %v663_v18, %v574_v47 }
  0xd8   : > { %v537_v50 = vpop.f32.mrf.mxu0 }
  0xd9   : > { %801 = vst.msk [vmem:[%s1315_s25 + $0x14] sm:$0xf] %vm795_vm3, %v768_v46  ;;  %v627_v51 = vadd.f32 %v626_v21, %v537_v50  ;;  %v716_v53 = vmul.f32 %v1302_v52, %v664_v49 }
  0xdb   : > { %v701_v54 = vmul.f32 %v1302_v52, %v627_v51  ;;  %v752_v56 = vadd.f32 %v1307_v55, %v716_v53 }
  0xdd   : > { %v737_v57 = vadd.f32 %v1307_v55, %v701_v54  ;;  %v784_v59 = vpack.c.bf16 %v752_v56, %v752_v56 }
  0xde   : > { %v633_v58 = vpop.f32.mrf.mxu1  ;;  %v577_v62 = vpop.f32.mrf.mxu2 }
  0xdf   : > { %v769_v61 = vpack.c.bf16 %v737_v57, %v737_v57  ;;  %817 = vst.msk [vmem:[%s1315_s25 + $0x54] sm:$0xf] %vm795_vm3, %v784_v59  ;;  %v667_v63 = vadd.f32 %v666_v33, %v577_v62 }
  0xe0   : > { %v539_v0 = vpop.f32.mrf.mxu0 }
  0xe1   : > { %802 = vst.msk [vmem:[%s1315_s25 + $0x18] sm:$0xf] %vm795_vm3, %v769_v61  ;;  %v629_v1 = vadd.f32 %v628_v32, %v539_v0  ;;  %v717_v3 = vmul.f32 %v1302_v52, %v667_v63  ;;  %v676_v32 = vpop.f32.mrf.mxu3 }
  0xe3   : > { %v702_v5 = vmul.f32 %v1302_v52, %v629_v1  ;;  %v753_v6 = vadd.f32 %v1307_v55, %v717_v3 }
  0xe5   : > { %v738_v7 = vadd.f32 %v1307_v55, %v702_v5  ;;  %v785_v9 = vpack.c.bf16 %v753_v6, %v753_v6 }
  0xe6   : > { %v636_v8 = vpop.f32.mrf.mxu1  ;;  %v579_v11 = vpop.f32.mrf.mxu2 }
  0xe7   : > { %v770_v10 = vpack.c.bf16 %v738_v7, %v738_v7  ;;  %818 = vst.msk [vmem:[%s1315_s25 + $0x58] sm:$0xf] %vm795_vm3, %v785_v9  ;;  %v669_v12 = vadd.f32 %v668_v48, %v579_v11 }
  0xe8   : > { %v542_v13 = vpop.f32.mrf.mxu0 }
  0xe9   : > { %803 = vst.msk [vmem:[%s1315_s25 + $0x1c] sm:$0xf] %vm795_vm3, %v770_v10  ;;  %v632_v14 = vadd.f32 %v631_v44, %v542_v13  ;;  %v718_v15 = vmul.f32 %v1302_v52, %v669_v12  ;;  %v678_v47 = vpop.f32.mrf.mxu3 }
  0xeb   : > { %v703_v16 = vmul.f32 %v1302_v52, %v632_v14  ;;  %v754_v18 = vadd.f32 %v1307_v55, %v718_v15 }
  0xed   : > { %v739_v19 = vadd.f32 %v1307_v55, %v703_v16  ;;  %v786_v21 = vpack.c.bf16 %v754_v18, %v754_v18 }
  0xee   : > { %v638_v20 = vpop.f32.mrf.mxu1  ;;  %v582_v23 = vpop.f32.mrf.mxu2 }
  0xef   : > { %v771_v22 = vpack.c.bf16 %v739_v19, %v739_v19  ;;  %819 = vst.msk [vmem:[%s1315_s25 + $0x5c] sm:$0xf] %vm795_vm3, %v786_v21  ;;  %v672_v24 = vadd.f32 %v671_v2, %v582_v23 }
  0xf0   : > { %v544_v25 = vpop.f32.mrf.mxu0 }
  0xf1   : > { %804 = vst.msk [vmem:[%s1315_s25 + $0x20] sm:$0xf] %vm795_vm3, %v771_v22  ;;  %v634_v26 = vadd.f32 %v633_v58, %v544_v25  ;;  %v719_v27 = vmul.f32 %v1302_v52, %v672_v24  ;;  %v681_v0 = vpop.f32.mrf.mxu3 }
  0xf3   : > { %v704_v28 = vmul.f32 %v1302_v52, %v634_v26  ;;  %v755_v29 = vadd.f32 %v1307_v55, %v719_v27 }
  0xf5   : > { %v740_v30 = vadd.f32 %v1307_v55, %v704_v28  ;;  %v787_v33 = vpack.c.bf16 %v755_v29, %v755_v29 }
  0xf6   : > { %v641_v31 = vpop.f32.mrf.mxu1  ;;  %v584_v35 = vpop.f32.mrf.mxu2 }
  0xf7   : > { %v772_v34 = vpack.c.bf16 %v740_v30, %v740_v30  ;;  %820 = vst.msk [vmem:[%s1315_s25 + $0x60] sm:$0xf] %vm795_vm3, %v787_v33  ;;  %v674_v36 = vadd.f32 %v673_v17, %v584_v35 }
  0xf8   : > { %v547_v37 = vpop.f32.mrf.mxu0 }
  0xf9   : > { %805 = vst.msk [vmem:[%s1315_s25 + $0x24] sm:$0xf] %vm795_vm3, %v772_v34  ;;  %v637_v38 = vadd.f32 %v636_v8, %v547_v37  ;;  %v720_v39 = vmul.f32 %v1302_v52, %v674_v36  ;;  %v683_v15 = vpop.f32.mrf.mxu3 }
  0xfb   : > { %v705_v40 = vmul.f32 %v1302_v52, %v637_v38  ;;  %v756_v41 = vadd.f32 %v1307_v55, %v720_v39 }
  0xfd   : > { %v741_v42 = vadd.f32 %v1307_v55, %v705_v40  ;;  %v788_v44 = vpack.c.bf16 %v756_v41, %v756_v41 }
  0xfe   : > { %v643_v43 = vpop.f32.mrf.mxu1  ;;  %v587_v46 = vpop.f32.mrf.mxu2 }
  0xff   : > { %v773_v45 = vpack.c.bf16 %v741_v42, %v741_v42  ;;  %821 = vst.msk [vmem:[%s1315_s25 + $0x64] sm:$0xf] %vm795_vm3, %v788_v44  ;;  %v677_v48 = vadd.f32 %v676_v32, %v587_v46 }
 0x100   : > { %v549_v49 = vpop.f32.mrf.mxu0 }
 0x101   : > { %806 = vst.msk [vmem:[%s1315_s25 + $0x28] sm:$0xf] %vm795_vm3, %v773_v45  ;;  %v639_v50 = vadd.f32 %v638_v20, %v549_v49  ;;  %v721_v51 = vmul.f32 %v1302_v52, %v677_v48  ;;  %v686_v32 = vpop.f32.mrf.mxu3 }
 0x103   : > { %v706_v53 = vmul.f32 %v1302_v52, %v639_v50  ;;  %v757_v54 = vadd.f32 %v1307_v55, %v721_v51 }
 0x105   : > { %v742_v56 = vadd.f32 %v1307_v55, %v706_v53  ;;  %v789_v58 = vpack.c.bf16 %v757_v54, %v757_v54 }
 0x106   : > { %v646_v57 = vpop.f32.mrf.mxu1  ;;  %v589_v61 = vpop.f32.mrf.mxu2 }
 0x107   : > { %v774_v59 = vpack.c.bf16 %v742_v56, %v742_v56  ;;  %822 = vst.msk [vmem:[%s1315_s25 + $0x68] sm:$0xf] %vm795_vm3, %v789_v58  ;;  %v679_v62 = vadd.f32 %v678_v47, %v589_v61 }
 0x108   : > { %v552_v63 = vpop.f32.mrf.mxu0 }
 0x109   : > { %807 = vst.msk [vmem:[%s1315_s25 + $0x2c] sm:$0xf] %vm795_vm3, %v774_v59  ;;  %v642_v1 = vadd.f32 %v641_v31, %v552_v63  ;;  %v722_v2 = vmul.f32 %v1302_v52, %v679_v62  ;;  %v688_v49 = vpop.f32.mrf.mxu3 }
 0x10b   : > { %v707_v3 = vmul.f32 %v1302_v52, %v642_v1  ;;  %v758_v5 = vadd.f32 %v1307_v55, %v722_v2 }
 0x10d   : > { %v743_v6 = vadd.f32 %v1307_v55, %v707_v3  ;;  %v790_v8 = vpack.c.bf16 %v758_v5, %v758_v5 }
 0x10e   : > { %v648_v7 = vpop.f32.mrf.mxu1  ;;  %v592_v10 = vpop.f32.mrf.mxu2 }
 0x10f   : > { %v775_v9 = vpack.c.bf16 %v743_v6, %v743_v6  ;;  %823 = vst.msk [vmem:[%s1315_s25 + $0x6c] sm:$0xf] %vm795_vm3, %v790_v8  ;;  %v682_v11 = vadd.f32 %v681_v0, %v592_v10 }
 0x110   : > { %v554_v12 = vpop.f32.mrf.mxu0 }
 0x111   : > { %808 = vst.msk [vmem:[%s1315_s25 + $0x30] sm:$0xf] %vm795_vm3, %v775_v9  ;;  %v644_v13 = vadd.f32 %v643_v43, %v554_v12  ;;  %v723_v14 = vmul.f32 %v1302_v52, %v682_v11 }
 0x113   : > { %v708_v16 = vmul.f32 %v1302_v52, %v644_v13  ;;  %v759_v17 = vadd.f32 %v1307_v55, %v723_v14 }
 0x115   : > { %v744_v18 = vadd.f32 %v1307_v55, %v708_v16  ;;  %v791_v20 = vpack.c.bf16 %v759_v17, %v759_v17 }
 0x116   : > { %v651_v19 = vpop.f32.mrf.mxu1  ;;  %v594_v23 = vpop.f32.mrf.mxu2 }
 0x117   : > { %v652_v21 = vadd.f32 %v651_v19, %v1317_v60  ;;  %v776_v22 = vpack.c.bf16 %v744_v18, %v744_v18  ;;  %824 = vst.msk [vmem:[%s1315_s25 + $0x70] sm:$0xf] %vm795_vm3, %v791_v20  ;;  %v684_v25 = vadd.f32 %v683_v15, %v594_v23 }
 0x118   : > { %v557_v26 = vpop.f32.mrf.mxu0 }
 0x119   : > { %v711_v24 = vmul.f32 %v1302_v52, %v652_v21  ;;  %809 = vst.msk [vmem:[%s1315_s25 + $0x34] sm:$0xf] %vm795_vm3, %v776_v22  ;;  %v647_v27 = vadd.f32 %v646_v57, %v557_v26  ;;  %v724_v29 = vmul.f32 %v1302_v52, %v684_v25 }
 0x11b   : > { %v747_v28 = vadd.f32 %v1307_v55, %v711_v24  ;;  %v709_v60 = vmul.f32 %v1302_v52, %v647_v27  ;;  %v760_v31 = vadd.f32 %v1307_v55, %v724_v29 }
 0x11d   : > { %v779_v30 = vpack.c.bf16 %v747_v28, %v747_v28  ;;  %v745_v33 = vadd.f32 %v1307_v55, %v709_v60  ;;  %v792_v35 = vpack.c.bf16 %v760_v31, %v760_v31 }
 0x11e   : > { %v653_v34 = vpop.f32.mrf.mxu1  ;;  %v597_v38 = vpop.f32.mrf.mxu2 }
 0x11f   : > { %812 = vst.msk [vmem:[%s1315_s25 + $0x40] sm:$0xf] %vm795_vm3, %v779_v30  ;;  %v654_v36 = vadd.f32 %v653_v34, %v1323_v4  ;;  %v777_v37 = vpack.c.bf16 %v745_v33, %v745_v33  ;;  %v687_v40 = vadd.f32 %v686_v32, %v597_v38 }
 0x120   : > { %825 = vst.msk [vmem:[%s1315_s25 + $0x74] sm:$0xf] %vm795_vm3, %v792_v35  ;;  %v559_v41 = vpop.f32.mrf.mxu0 }
 0x121   : > { %v712_v39 = vmul.f32 %v1302_v52, %v654_v36  ;;  %810 = vst.msk [vmem:[%s1315_s25 + $0x38] sm:$0xf] %vm795_vm3, %v777_v37  ;;  %v649_v42 = vadd.f32 %v648_v7, %v559_v41  ;;  %v725_v44 = vmul.f32 %v1302_v52, %v687_v40 }
 0x123   : > { %v748_v43 = vadd.f32 %v1307_v55, %v712_v39  ;;  %v710_v4 = vmul.f32 %v1302_v52, %v649_v42  ;;  %v761_v46 = vadd.f32 %v1307_v55, %v725_v44 }
 0x125   : > { %v780_v45 = vpack.c.bf16 %v748_v43, %v748_v43  ;;  %v746_v47 = vadd.f32 %v1307_v55, %v710_v4  ;;  %v793_v48 = vpack.c.bf16 %v761_v46, %v761_v46 }
 0x126   : > { %v599_v51 = vpop.f32.mrf.mxu2 }
 0x127   : > { %813 = vst.msk [vmem:[%s1315_s25 + $0x44] sm:$0xf] %vm795_vm3, %v780_v45  ;;  %v778_v50 = vpack.c.bf16 %v746_v47, %v746_v47  ;;  %v689_v53 = vadd.f32 %v688_v49, %v599_v51 }
 0x128   : > { %826 = vst.msk [vmem:[%s1315_s25 + $0x78] sm:$0xf] %vm795_vm3, %v793_v48 }
 0x129   : > { %811 = vst.msk [vmem:[%s1315_s25 + $0x3c] sm:$0xf] %vm795_vm3, %v778_v50  ;;  %v726_v54 = vmul.f32 %v1302_v52, %v689_v53 }
 0x12b   : > { %v762_v56 = vadd.f32 %v1307_v55, %v726_v54 }
 0x12d   : > { %v794_v57 = vpack.c.bf16 %v762_v56, %v762_v56 }
 0x12f   : > { %827 = vst.msk [vmem:[%s1315_s25 + $0x7c] sm:$0xf] %vm795_vm3, %v794_v57 }
 0x130 PF: > { %s14_s15 = sadd.s32 1, %s1145_s15  }
 0x131   : > { %p11_p4 = scmp.ge.s32.totalorder %s14_s15, 4  }
 0x133   :  { %13 = sbr.rel (!%p11_p4) target bundleno = 1 (0x1), region = 66 }

// kernel: resnet_forward.5
= control target key start
LH: loop header
LB: loop body
LE: loop exit
PB: predicated region body
PF: predicated region fallthrough
CT: control target
= control target key end

     0   :  { %s764_s9 = smov 0   ;;  %s766_s10 = smov 0   ;;  %s1028_s0 = inlined_call_operand.vmem [shape: bf16[2,256,64], index: 0, kind: input, shape index: {}]   ;;  %s1029_s1 = inlined_call_operand.vmem [shape: f32[2,4,1,64], index: 1, kind: input, shape index: {}]   ;;  %s1030_s2 = inlined_call_operand.vmem [shape: bf16[2,256,64], index: 2, kind: output, shape index: {}]  }
   0x1   :  { %s768_s11 = smov 0  }
   0x2 LB: > { %s24_s12 = sadd.s32 1, %s743_s10  ;;  %p608_p0 = scmp.ge.s32.totalorder %s747_s11, 1  ;;  %s747_s11 = sphi %s768_s11, %s12_s11   ;;  %s743_s10 = sphi %s766_s10, %s1032_s10   ;;  %s739_s9 = sphi %s764_s9, %s1031_s9  }
   0x3   : > { %p26_p1 = scmp.ge.s32.totalorder %s24_s12, 2  ;;  %p142_p2 = scmp.lt.s32.totalorder %s747_s11, 3 }
   0x5   : > { %s1034_s12 = smov (%p26_p1, %s24_s12), 0  ;;  %p143_p3 = pnand %p608_p0, %p142_p2 }
   0x6   : > { %p177_p4 = scmp.lt.s32.totalorder (!%p143_p3), %s739_s9, 1 }
   0x7   : > { %146 = sbr.rel (%p143_p3) target bundleno = 79 (0x4f), region = 28 }
   0xc   : > { %s1036_s9 = smov (!%p177_p4, %s739_s9), 1  ;;  %vm472_vm0 = vcmask 519168  }
   0xd   : > { %s616_s13 = sshll.u32 %s1036_s9, 7  ;;  %s611_s14 = sshll.u32 %s1036_s9, 2 }
   0xe   : > { %s791_s17 = scalar_lea.vmem %s1028_s0, %s616_s13  ;;  %s189_s20 = scalar_lea.vmem %s1029_s1, %s611_s14 }
   0xf   : > { %v619_v0 = vld [vmem:[%s791_s17] sm:$0xff]   ;;  %v682_v9 = vld [vmem:[%s791_s17 + $0x8] sm:$0xff]   ;;  %v683_v10 = vld [vmem:[%s791_s17 + $0x10] sm:$0xff]   ;;  %s829_s23 = scalar_lea.vmem %s1030_s2, %s616_s13 }
  0x10   : > { %v620_v1 = vunpack.c.l.bf16 %v619_v0  ;;  %v797_v2 = vld [vmem:[%s189_s20] ss:$0 sm:$0xff]  ;;  %v621_v3 = vunpack.c.h.bf16 %v619_v0  ;;  %v799_v4 = vld [vmem:[%s189_s20 + $0x2] ss:$0 sm:$0xff]  ;;  %v801_v5 = vld [vmem:[%s189_s20 + $0x1] ss:$0 sm:$0xff]  ;;  %v624_v13 = vunpack.c.l.bf16 %v682_v9  ;;  %v625_v14 = vunpack.c.h.bf16 %v682_v9 }
  0x11   : > { %v803_v6 = vld [vmem:[%s189_s20 + $0x3] ss:$0 sm:$0xff]  ;;  %v628_v17 = vunpack.c.l.bf16 %v683_v10  ;;  %v629_v18 = vunpack.c.h.bf16 %v683_v10  ;;  %v684_v31 = vld [vmem:[%s791_s17 + $0x18] sm:$0xff]   ;;  %v686_v61 = vld [vmem:[%s791_s17 + $0x28] sm:$0xff]  }
  0x12   : > { %v271_v7 = vmul.f32 %v797_v2, %v620_v1  ;;  %v272_v8 = vmul.f32 %v797_v2, %v621_v3  ;;  %v341_v11 = vmul.f32 %v801_v5, %v620_v1  ;;  %v342_v12 = vmul.f32 %v801_v5, %v621_v3  ;;  %v685_v36 = vld [vmem:[%s791_s17 + $0x20] sm:$0xff]   ;;  %v687_v3 = vld [vmem:[%s791_s17 + $0x30] sm:$0xff]  }
  0x13   : > { %v273_v21 = vmul.f32 %v797_v2, %v624_v13  ;;  %v343_v22 = vmul.f32 %v801_v5, %v624_v13  ;;  %v274_v23 = vmul.f32 %v797_v2, %v625_v14  ;;  %v344_v24 = vmul.f32 %v801_v5, %v625_v14 }
  0x14   : > { %v306_v15 = vadd.f32 %v799_v4, %v271_v7  ;;  %v307_v16 = vadd.f32 %v799_v4, %v272_v8  ;;  %v376_v19 = vadd.f32 %v803_v6, %v341_v11  ;;  %v377_v20 = vadd.f32 %v803_v6, %v342_v12 }
  0x15   : > { %v275_v25 = vmul.f32 %v797_v2, %v628_v17  ;;  %v345_v26 = vmul.f32 %v801_v5, %v628_v17  ;;  %v308_v29 = vadd.f32 %v799_v4, %v273_v21  ;;  %v378_v30 = vadd.f32 %v803_v6, %v343_v22 }
  0x16   : > { %v408_v27 = vmax.f32 %v306_v15, %v376_v19  ;;  %v409_v28 = vmax.f32 %v307_v16, %v377_v20  ;;  %v309_v32 = vadd.f32 %v799_v4, %v274_v23  ;;  %v379_v33 = vadd.f32 %v803_v6, %v344_v24 }
  0x17   : > { %v310_v34 = vadd.f32 %v799_v4, %v275_v25  ;;  %v380_v35 = vadd.f32 %v803_v6, %v345_v26  ;;  %v410_v39 = vmax.f32 %v308_v29, %v378_v30  ;;  %v276_v40 = vmul.f32 %v797_v2, %v629_v18 }
  0x18   : > { %v440_v37 = vpack.c.bf16 %v408_v27, %v408_v27  ;;  %v441_v38 = vpack.c.bf16 %v409_v28, %v409_v28  ;;  %v411_v41 = vmax.f32 %v309_v32, %v379_v33  ;;  %v346_v43 = vmul.f32 %v801_v5, %v629_v18  ;;  %v688_v27 = vld [vmem:[%s791_s17 + $0x38] sm:$0xff]  }
  0x19   : > { %v412_v42 = vmax.f32 %v310_v34, %v380_v35  ;;  %v632_v44 = vunpack.c.l.bf16 %v684_v31  ;;  %v442_v45 = vpack.c.bf16 %v410_v39, %v410_v39  ;;  %v311_v46 = vadd.f32 %v799_v4, %v276_v40 }
  0x1a   : > { %473 = vst.msk [vmem:[%s829_s23] sm:$0xf] %vm472_vm0, %v440_v37  ;;  %v633_v47 = vunpack.c.h.bf16 %v684_v31  ;;  %v636_v48 = vunpack.c.l.bf16 %v685_v36  ;;  %v443_v49 = vpack.c.bf16 %v411_v41, %v411_v41  ;;  %v381_v51 = vadd.f32 %v803_v6, %v346_v43 }
  0x1b   : > { %474 = vst.msk [vmem:[%s829_s23 + $0x4] sm:$0xf] %vm472_vm0, %v441_v38  ;;  %v444_v50 = vpack.c.bf16 %v412_v42, %v412_v42  ;;  %v277_v52 = vmul.f32 %v797_v2, %v632_v44  ;;  %v347_v53 = vmul.f32 %v801_v5, %v632_v44  ;;  %v637_v60 = vunpack.c.h.bf16 %v685_v36 }
  0x1c   : > { %475 = vst.msk [vmem:[%s829_s23 + $0x8] sm:$0xf] %vm472_vm0, %v442_v45  ;;  %v278_v54 = vmul.f32 %v797_v2, %v633_v47  ;;  %v348_v55 = vmul.f32 %v801_v5, %v633_v47  ;;  %v279_v56 = vmul.f32 %v797_v2, %v636_v48  ;;  %v413_v57 = vmax.f32 %v311_v46, %v381_v51 }
  0x1d   : > { %476 = vst.msk [vmem:[%s829_s23 + $0xc] sm:$0xf] %vm472_vm0, %v443_v49  ;;  %v312_v58 = vadd.f32 %v799_v4, %v277_v52  ;;  %v349_v59 = vmul.f32 %v801_v5, %v636_v48  ;;  %v382_v62 = vadd.f32 %v803_v6, %v347_v53  ;;  %v280_v9 = vmul.f32 %v797_v2, %v637_v60  ;;  %v689_v48 = vld [vmem:[%s791_s17 + $0x40] sm:$0xff]   ;;  %v690_v53 = vld [vmem:[%s791_s17 + $0x48] sm:$0xff]  }
  0x1e   : > { %477 = vst.msk [vmem:[%s829_s23 + $0x10] sm:$0xf] %vm472_vm0, %v444_v50  ;;  %v313_v63 = vadd.f32 %v799_v4, %v278_v54  ;;  %v383_v0 = vadd.f32 %v803_v6, %v348_v55  ;;  %v314_v1 = vadd.f32 %v799_v4, %v279_v56  ;;  %v445_v7 = vpack.c.bf16 %v413_v57, %v413_v57 }
  0x1f   : > { %v384_v8 = vadd.f32 %v803_v6, %v349_v59  ;;  %v350_v10 = vmul.f32 %v801_v5, %v637_v60  ;;  %v414_v11 = vmax.f32 %v312_v58, %v382_v62  ;;  %v640_v13 = vunpack.c.l.bf16 %v686_v61 }
  0x20   : > { %v415_v12 = vmax.f32 %v313_v63, %v383_v0  ;;  %v641_v14 = vunpack.c.h.bf16 %v686_v61  ;;  %478 = vst.msk [vmem:[%s829_s23 + $0x14] sm:$0xf] %vm472_vm0, %v445_v7  ;;  %v315_v16 = vadd.f32 %v799_v4, %v280_v9  ;;  %v644_v18 = vunpack.c.l.bf16 %v687_v3 }
  0x21   : > { %v416_v15 = vmax.f32 %v314_v1, %v384_v8  ;;  %v385_v17 = vadd.f32 %v803_v6, %v350_v10  ;;  %v446_v19 = vpack.c.bf16 %v414_v11, %v414_v11  ;;  %v281_v21 = vmul.f32 %v797_v2, %v640_v13 }
  0x22   : > { %v447_v20 = vpack.c.bf16 %v415_v12, %v415_v12  ;;  %v351_v22 = vmul.f32 %v801_v5, %v640_v13  ;;  %v282_v25 = vmul.f32 %v797_v2, %v641_v14  ;;  %v352_v26 = vmul.f32 %v801_v5, %v641_v14  ;;  %v691_v14 = vld [vmem:[%s791_s17 + $0x50] sm:$0xff]  }
  0x23   : > { %v448_v23 = vpack.c.bf16 %v416_v15, %v416_v15  ;;  %v417_v24 = vmax.f32 %v315_v16, %v385_v17  ;;  %479 = vst.msk [vmem:[%s829_s23 + $0x18] sm:$0xf] %vm472_vm0, %v446_v19  ;;  %v316_v28 = vadd.f32 %v799_v4, %v281_v21  ;;  %v283_v30 = vmul.f32 %v797_v2, %v644_v18  ;;  %v692_v19 = vld [vmem:[%s791_s17 + $0x58] sm:$0xff]  }
  0x24   : > { %v386_v29 = vadd.f32 %v803_v6, %v351_v22  ;;  %v353_v31 = vmul.f32 %v801_v5, %v644_v18  ;;  %480 = vst.msk [vmem:[%s829_s23 + $0x1c] sm:$0xf] %vm472_vm0, %v447_v20  ;;  %v317_v33 = vadd.f32 %v799_v4, %v282_v25  ;;  %v387_v34 = vadd.f32 %v803_v6, %v352_v26 }
  0x25   : > { %v449_v32 = vpack.c.bf16 %v417_v24, %v417_v24  ;;  %v645_v35 = vunpack.c.h.bf16 %v687_v3  ;;  %481 = vst.msk [vmem:[%s829_s23 + $0x20] sm:$0xf] %vm472_vm0, %v448_v23  ;;  %v318_v37 = vadd.f32 %v799_v4, %v283_v30  ;;  %v648_v39 = vunpack.c.l.bf16 %v688_v27 }
  0x26   : > { %v418_v36 = vmax.f32 %v316_v28, %v386_v29  ;;  %v388_v38 = vadd.f32 %v803_v6, %v353_v31  ;;  %v419_v40 = vmax.f32 %v317_v33, %v387_v34  ;;  %v649_v43 = vunpack.c.h.bf16 %v688_v27 }
  0x27   : > { %482 = vst.msk [vmem:[%s829_s23 + $0x24] sm:$0xf] %vm472_vm0, %v449_v32  ;;  %v284_v41 = vmul.f32 %v797_v2, %v645_v35  ;;  %v354_v42 = vmul.f32 %v801_v5, %v645_v35  ;;  %v285_v46 = vmul.f32 %v797_v2, %v648_v39  ;;  %v355_v47 = vmul.f32 %v801_v5, %v648_v39 }
  0x28   : > { %v450_v44 = vpack.c.bf16 %v418_v36, %v418_v36  ;;  %v420_v45 = vmax.f32 %v318_v37, %v388_v38  ;;  %v451_v49 = vpack.c.bf16 %v419_v40, %v419_v40  ;;  %v286_v52 = vmul.f32 %v797_v2, %v649_v43  ;;  %v693_v40 = vld [vmem:[%s791_s17 + $0x60] sm:$0xff]  }
  0x29   : > { %v319_v50 = vadd.f32 %v799_v4, %v284_v41  ;;  %v389_v51 = vadd.f32 %v803_v6, %v354_v42  ;;  %v320_v55 = vadd.f32 %v799_v4, %v285_v46  ;;  %v390_v56 = vadd.f32 %v803_v6, %v355_v47 }
  0x2a   : > { %483 = vst.msk [vmem:[%s829_s23 + $0x28] sm:$0xf] %vm472_vm0, %v450_v44  ;;  %v452_v54 = vpack.c.bf16 %v420_v45, %v420_v45  ;;  %v356_v57 = vmul.f32 %v801_v5, %v649_v43  ;;  %v321_v59 = vadd.f32 %v799_v4, %v286_v52  ;;  %v652_v60 = vunpack.c.l.bf16 %v689_v48 }
  0x2b   : > { %484 = vst.msk [vmem:[%s829_s23 + $0x2c] sm:$0xf] %vm472_vm0, %v451_v49  ;;  %v421_v58 = vmax.f32 %v319_v50, %v389_v51  ;;  %v653_v61 = vunpack.c.h.bf16 %v689_v48  ;;  %v422_v62 = vmax.f32 %v320_v55, %v390_v56  ;;  %v656_v0 = vunpack.c.l.bf16 %v690_v53 }
  0x2c   : > { %485 = vst.msk [vmem:[%s829_s23 + $0x30] sm:$0xf] %vm472_vm0, %v452_v54  ;;  %v391_v63 = vadd.f32 %v803_v6, %v356_v57  ;;  %v657_v1 = vunpack.c.h.bf16 %v690_v53  ;;  %v287_v7 = vmul.f32 %v797_v2, %v652_v60  ;;  %v357_v8 = vmul.f32 %v801_v5, %v652_v60 }
  0x2d   : > { %v453_v3 = vpack.c.bf16 %v421_v58, %v421_v58  ;;  %v288_v9 = vmul.f32 %v797_v2, %v653_v61  ;;  %v454_v10 = vpack.c.bf16 %v422_v62, %v422_v62  ;;  %v358_v12 = vmul.f32 %v801_v5, %v653_v61  ;;  %v694_v61 = vld [vmem:[%s791_s17 + $0x68] sm:$0xff]  }
  0x2e   : > { %v423_v11 = vmax.f32 %v321_v59, %v391_v63  ;;  %v289_v13 = vmul.f32 %v797_v2, %v656_v0  ;;  %v322_v15 = vadd.f32 %v799_v4, %v287_v7  ;;  %v392_v16 = vadd.f32 %v803_v6, %v357_v8 }
  0x2f   : > { %486 = vst.msk [vmem:[%s829_s23 + $0x34] sm:$0xf] %vm472_vm0, %v453_v3  ;;  %v323_v17 = vadd.f32 %v799_v4, %v288_v9  ;;  %v359_v18 = vmul.f32 %v801_v5, %v656_v0  ;;  %v393_v21 = vadd.f32 %v803_v6, %v358_v12  ;;  %v290_v23 = vmul.f32 %v797_v2, %v657_v1  ;;  %v695_v3 = vld [vmem:[%s791_s17 + $0x70] sm:$0xff]  }
  0x30   : > { %487 = vst.msk [vmem:[%s829_s23 + $0x38] sm:$0xf] %vm472_vm0, %v454_v10  ;;  %v455_v20 = vpack.c.bf16 %v423_v11, %v423_v11  ;;  %v324_v22 = vadd.f32 %v799_v4, %v289_v13  ;;  %v424_v24 = vmax.f32 %v322_v15, %v392_v16  ;;  %v360_v26 = vmul.f32 %v801_v5, %v657_v1 }
  0x31   : > { %v394_v25 = vadd.f32 %v803_v6, %v359_v18  ;;  %v660_v27 = vunpack.c.l.bf16 %v691_v14  ;;  %v425_v28 = vmax.f32 %v323_v17, %v393_v21  ;;  %v325_v29 = vadd.f32 %v799_v4, %v290_v23 }
  0x32   : > { %488 = vst.msk [vmem:[%s829_s23 + $0x3c] sm:$0xf] %vm472_vm0, %v455_v20  ;;  %v661_v30 = vunpack.c.h.bf16 %v691_v14  ;;  %v664_v31 = vunpack.c.l.bf16 %v692_v19  ;;  %v456_v32 = vpack.c.bf16 %v424_v24, %v424_v24  ;;  %v395_v34 = vadd.f32 %v803_v6, %v360_v26 }
  0x33   : > { %v426_v33 = vmax.f32 %v324_v22, %v394_v25  ;;  %v291_v35 = vmul.f32 %v797_v2, %v660_v27  ;;  %v457_v36 = vpack.c.bf16 %v425_v28, %v425_v28  ;;  %v361_v37 = vmul.f32 %v801_v5, %v660_v27 }
  0x34   : > { %v292_v38 = vmul.f32 %v797_v2, %v661_v30  ;;  %v362_v39 = vmul.f32 %v801_v5, %v661_v30  ;;  %489 = vst.msk [vmem:[%s829_s23 + $0x40] sm:$0xf] %vm472_vm0, %v456_v32  ;;  %v427_v42 = vmax.f32 %v325_v29, %v395_v34  ;;  %v293_v44 = vmul.f32 %v797_v2, %v664_v31 }
  0x35   : > { %v458_v41 = vpack.c.bf16 %v426_v33, %v426_v33  ;;  %v326_v43 = vadd.f32 %v799_v4, %v291_v35  ;;  %490 = vst.msk [vmem:[%s829_s23 + $0x44] sm:$0xf] %vm472_vm0, %v457_v36  ;;  %v396_v45 = vadd.f32 %v803_v6, %v361_v37  ;;  %v363_v48 = vmul.f32 %v801_v5, %v664_v31  ;;  %v696_v31 = vld [vmem:[%s791_s17 + $0x78] sm:$0xff]  }
  0x36   : > { %v327_v46 = vadd.f32 %v799_v4, %v292_v38  ;;  %v397_v47 = vadd.f32 %v803_v6, %v362_v39  ;;  %v459_v49 = vpack.c.bf16 %v427_v42, %v427_v42  ;;  %v328_v50 = vadd.f32 %v799_v4, %v293_v44 }
  0x37   : > { %491 = vst.msk [vmem:[%s829_s23 + $0x48] sm:$0xf] %vm472_vm0, %v458_v41  ;;  %v665_v51 = vunpack.c.h.bf16 %v692_v19  ;;  %v668_v52 = vunpack.c.l.bf16 %v693_v40  ;;  %v428_v53 = vmax.f32 %v326_v43, %v396_v45  ;;  %v398_v55 = vadd.f32 %v803_v6, %v363_v48 }
  0x38   : > { %v429_v54 = vmax.f32 %v327_v46, %v397_v47  ;;  %v669_v56 = vunpack.c.h.bf16 %v693_v40  ;;  %492 = vst.msk [vmem:[%s829_s23 + $0x4c] sm:$0xf] %vm472_vm0, %v459_v49  ;;  %v672_v14 = vunpack.c.l.bf16 %v694_v61  ;;  %v673_v17 = vunpack.c.h.bf16 %v694_v61 }
  0x39   : > { %v294_v57 = vmul.f32 %v797_v2, %v665_v51  ;;  %v364_v58 = vmul.f32 %v801_v5, %v665_v51  ;;  %v295_v59 = vmul.f32 %v797_v2, %v668_v52  ;;  %v365_v60 = vmul.f32 %v801_v5, %v668_v52 }
  0x3a   : > { %v460_v62 = vpack.c.bf16 %v428_v53, %v428_v53  ;;  %v461_v63 = vpack.c.bf16 %v429_v54, %v429_v54  ;;  %v430_v0 = vmax.f32 %v328_v50, %v398_v55  ;;  %v296_v1 = vmul.f32 %v797_v2, %v669_v56 }
  0x3b   : > { %v329_v7 = vadd.f32 %v799_v4, %v294_v57  ;;  %v399_v8 = vadd.f32 %v803_v6, %v364_v58  ;;  %v330_v9 = vadd.f32 %v799_v4, %v295_v59  ;;  %v400_v10 = vadd.f32 %v803_v6, %v365_v60 }
  0x3c   : > { %493 = vst.msk [vmem:[%s829_s23 + $0x50] sm:$0xf] %vm472_vm0, %v460_v62  ;;  %v462_v11 = vpack.c.bf16 %v430_v0, %v430_v0  ;;  %v331_v12 = vadd.f32 %v799_v4, %v296_v1  ;;  %v366_v13 = vmul.f32 %v801_v5, %v669_v56  ;;  %v676_v18 = vunpack.c.l.bf16 %v695_v3 }
  0x3d   : > { %494 = vst.msk [vmem:[%s829_s23 + $0x54] sm:$0xf] %vm472_vm0, %v461_v63  ;;  %v431_v15 = vmax.f32 %v329_v7, %v399_v8  ;;  %v432_v16 = vmax.f32 %v330_v9, %v400_v10  ;;  %v297_v20 = vmul.f32 %v797_v2, %v672_v14  ;;  %v367_v21 = vmul.f32 %v801_v5, %v672_v14 }
  0x3e   : > { %495 = vst.msk [vmem:[%s829_s23 + $0x58] sm:$0xf] %vm472_vm0, %v462_v11  ;;  %v401_v19 = vadd.f32 %v803_v6, %v366_v13  ;;  %v677_v22 = vunpack.c.h.bf16 %v695_v3  ;;  %v298_v25 = vmul.f32 %v797_v2, %v673_v17  ;;  %v368_v26 = vmul.f32 %v801_v5, %v673_v17 }
  0x3f   : > { %v463_v23 = vpack.c.bf16 %v431_v15, %v431_v15  ;;  %v464_v24 = vpack.c.bf16 %v432_v16, %v432_v16  ;;  %v332_v28 = vadd.f32 %v799_v4, %v297_v20  ;;  %v402_v29 = vadd.f32 %v803_v6, %v367_v21 }
  0x40   : > { %v433_v27 = vmax.f32 %v331_v12, %v401_v19  ;;  %v299_v30 = vmul.f32 %v797_v2, %v676_v18  ;;  %v333_v32 = vadd.f32 %v799_v4, %v298_v25  ;;  %v403_v33 = vadd.f32 %v803_v6, %v368_v26 }
  0x41   : > { %496 = vst.msk [vmem:[%s829_s23 + $0x5c] sm:$0xf] %vm472_vm0, %v463_v23  ;;  %v369_v34 = vmul.f32 %v801_v5, %v676_v18  ;;  %v300_v35 = vmul.f32 %v797_v2, %v677_v22  ;;  %v434_v37 = vmax.f32 %v332_v28, %v402_v29  ;;  %v370_v39 = vmul.f32 %v801_v5, %v677_v22 }
  0x42   : > { %497 = vst.msk [vmem:[%s829_s23 + $0x60] sm:$0xf] %vm472_vm0, %v464_v24  ;;  %v465_v36 = vpack.c.bf16 %v433_v27, %v433_v27  ;;  %v334_v38 = vadd.f32 %v799_v4, %v299_v30  ;;  %v435_v40 = vmax.f32 %v333_v32, %v403_v33  ;;  %v680_v43 = vunpack.c.l.bf16 %v696_v31 }
  0x43   : > { %v404_v41 = vadd.f32 %v803_v6, %v369_v34  ;;  %v335_v42 = vadd.f32 %v799_v4, %v300_v35  ;;  %v466_v44 = vpack.c.bf16 %v434_v37, %v434_v37  ;;  %v405_v45 = vadd.f32 %v803_v6, %v370_v39 }
  0x44   : > { %498 = vst.msk [vmem:[%s829_s23 + $0x64] sm:$0xf] %vm472_vm0, %v465_v36  ;;  %v681_v46 = vunpack.c.h.bf16 %v696_v31  ;;  %v467_v47 = vpack.c.bf16 %v435_v40, %v435_v40  ;;  %v301_v49 = vmul.f32 %v797_v2, %v680_v43  ;;  %v371_v50 = vmul.f32 %v801_v5, %v680_v43 }
  0x45   : > { %v436_v48 = vmax.f32 %v334_v38, %v404_v41  ;;  %499 = vst.msk [vmem:[%s829_s23 + $0x68] sm:$0xf] %vm472_vm0, %v466_v44  ;;  %v437_v51 = vmax.f32 %v335_v42, %v405_v45 }
  0x46   : > { %v302_v52 = vmul.f32 %v797_v2, %v681_v46  ;;  %v372_v53 = vmul.f32 %v801_v5, %v681_v46  ;;  %500 = vst.msk [vmem:[%s829_s23 + $0x6c] sm:$0xf] %vm472_vm0, %v467_v47  ;;  %v336_v55 = vadd.f32 %v799_v4, %v301_v49  ;;  %v406_v56 = vadd.f32 %v803_v6, %v371_v50 }
  0x47   : > { %v468_v54 = vpack.c.bf16 %v436_v48, %v436_v48  ;;  %v469_v57 = vpack.c.bf16 %v437_v51, %v437_v51 }
  0x48   : > { %v337_v58 = vadd.f32 %v799_v4, %v302_v52  ;;  %v407_v59 = vadd.f32 %v803_v6, %v372_v53  ;;  %v438_v60 = vmax.f32 %v336_v55, %v406_v56 }
  0x49   : > { %501 = vst.msk [vmem:[%s829_s23 + $0x70] sm:$0xf] %vm472_vm0, %v468_v54 }
  0x4a   : > { %502 = vst.msk [vmem:[%s829_s23 + $0x74] sm:$0xf] %vm472_vm0, %v469_v57  ;;  %v439_v2 = vmax.f32 %v337_v58, %v407_v59  ;;  %v470_v61 = vpack.c.bf16 %v438_v60, %v438_v60 }
  0x4c   : > { %v471_v5 = vpack.c.bf16 %v439_v2, %v439_v2  ;;  %503 = vst.msk [vmem:[%s829_s23 + $0x78] sm:$0xf] %vm472_vm0, %v470_v61 }
  0x4e   : > { %504 = vst.msk [vmem:[%s829_s23 + $0x7c] sm:$0xf] %vm472_vm0, %v471_v5 }
  0x4f PF: > { %s12_s11 = sadd.s32 1, %s747_s11   ;;  %s1031_s9 = smov %s743_s10 }
  0x50   : > { %p9_p5 = scmp.ge.s32.totalorder %s12_s11, 4   ;;  %s1032_s10 = smov %s1034_s12 }
  0x52   :  { %11 = sbr.rel (!%p9_p5) target bundleno = 2 (0x2), region = 61 }

// kernel: resnet_forward.6
= control target key start
LH: loop header
LB: loop body
LE: loop exit
PB: predicated region body
PF: predicated region fallthrough
CT: control target
= control target key end

     0   :  { %s1235_s15 = smov 0   ;;  %s1463_s0 = inlined_call_operand.vmem [shape: bf16[128,576], index: 0, kind: input, shape index: {}]   ;;  %s1464_s1 = inlined_call_operand.vmem [shape: bf16[576,64], index: 1, kind: input, shape index: {}]   ;;  %s1465_s2 = inlined_call_operand.vmem [shape: f32[1,64], index: 2, kind: input, shape index: {}]   ;;  %s1466_s3 = inlined_call_operand.vmem [shape: f32[1,64], index: 3, kind: input, shape index: {}]   ;;  %s1467_s4 = inlined_call_operand.vmem [shape: bf16[128,64], index: 4, kind: output, shape index: {}]  }
   0x1 LB: > { %s880_s16 = sadd.s32 4294967295, %s1208_s15   ;;  %p884_p0 = scmp.ge.s32.totalorder %s1208_s15, 1  ;;  %s1208_s15 = sphi %s1235_s15, %s14_s15  }
   0x2   : > { %p164_p1 = scmp.lt.s32.totalorder %s1208_s15, 3 }
   0x4   : > { %p165_p2 = pnand %p884_p0, %p164_p1 }
   0x5   : > { %s885_s27 = sshll.u32 (!%p165_p2), %s880_s16, 3 }
   0x6   : > { %168 = sbr.rel (%p165_p2) target bundleno = 278 (0x116), region = 36  ;;  %p192_p3 = scmp.lt.s32.totalorder (!%p165_p2), %s885_s27, 15 }
   0xb   : > { %v1146_v0 = vld [vmem:[%s1464_s1 + $0x38] sm:$0xff]  ;;  %v1145_v1 = vld [vmem:[%s1464_s1 + $0x30] sm:$0xff]  ;;  %v1144_v4 = vld [vmem:[%s1464_s1 + $0x28] sm:$0xff]  ;;  %s1469_s27 = smov (!%p192_p3, %s885_s27), 15  ;;  %vm617_vm0 = vcmask 523264   ;;  %vm815_vm1 = vcmask 519168  }
   0xc   : > { %1175 = vmatpush.bf16.msra.mxu1 %v1146_v0  ;;  %1176 = vmatpush.bf16.msra.mxu2 %v1146_v0  ;;  %v1170_v2 = vld [vmem:[%s1464_s1 + $0xf8] sm:$0xff]  ;;  %v1169_v3 = vld [vmem:[%s1464_s1 + $0xf0] sm:$0xff]  ;;  %v1168_v5 = vld [vmem:[%s1464_s1 + $0xe8] sm:$0xff]  ;;  %s1191_s14 = smul.u32 20, %s1469_s27  ;;  %s888_s26 = sshll.u32 %s1469_s27, 2 }
   0xd   : > { %630 = vmatpush.bf16.msra.mxu0 %v1146_v0  ;;  %717 = vmatpush.bf16.msra.mxu3 %v1170_v2  ;;  %v1143_v6 = vld [vmem:[%s1464_s1 + $0x20] sm:$0xff]  ;;  %v1142_v8 = vld [vmem:[%s1464_s1 + $0x18] sm:$0xff]  ;;  %v1141_v10 = vld [vmem:[%s1464_s1 + $0x10] sm:$0xff]  ;;  %s1425_s30 = scalar_lea.vmem %s1467_s4, %s888_s26 }
   0xe   : > { %v1167_v7 = vld [vmem:[%s1464_s1 + $0xe0] sm:$0xff]  ;;  %v1166_v9 = vld [vmem:[%s1464_s1 + $0xd8] sm:$0xff]  ;;  %v1165_v11 = vld [vmem:[%s1464_s1 + $0xd0] sm:$0xff]  ;;  %s1288_s22 = scalar_lea.vmem %s1463_s0, %s1191_s14 }
   0xf   : > { %v1140_v12 = vld [vmem:[%s1464_s1 + $0x8] sm:$0xff]  ;;  %v1139_v14 = vld [vmem:[%s1464_s1] sm:$0xff]  ;;  %v1126_v16 = vld [vmem:[%s1288_s22 + $0x38] sm:$0xf0] }
  0x10   : > { %1177 = vmatpush.bf16.msra.mxu1 %v1145_v1  ;;  %1178 = vmatpush.bf16.msra.mxu2 %v1145_v1  ;;  %v1164_v13 = vld [vmem:[%s1464_s1 + $0xc8] sm:$0xff]  ;;  %v951_v17 = vld [vmem:[%s1288_s22 + $0x78] sm:$0xf]  ;;  %v891_v21 = vld [vmem:[%s1288_s22] sm:$0xf] }
  0x11   : > { %631 = vmatpush.bf16.msra.mxu0 %v1145_v1  ;;  %718 = vmatpush.bf16.msra.mxu3 %v1169_v3  ;;  %v911_v15 = vld [vmem:[%s1288_s22 + $0x28] sm:$0xf]  ;;  %v1136_v18 = vld [vmem:[%s1288_s22 + $0x88] sm:$0xf0]  ;;  %v1162_v19 = vld [vmem:[%s1464_s1 + $0xb8] sm:$0xff] }
  0x12   : > { %v1154_v20 = vld [vmem:[%s1464_s1 + $0x78] sm:$0xff]  ;;  %v1163_v22 = vld [vmem:[%s1464_s1 + $0xc0] sm:$0xff]  ;;  %v912_v23 = vor.u32 %v1126_v16, %v911_v15  ;;  %v952_v24 = vor.u32 %v1136_v18, %v951_v17  ;;  %v1121_v25 = vld [vmem:[%s1288_s22 + $0x10] sm:$0xf0] }
  0x13   : > { %v1120_v26 = vld [vmem:[%s1288_s22 + $0xc] sm:$0xf]  ;;  %v901_v27 = vld [vmem:[%s1288_s22 + $0x1c] sm:$0xf0]  ;;  %v1174_v28 = vld [vmem:[%s1464_s1 + $0x118] sm:$0xff]  ;;  %v892_v31 = vor.u32 %v1121_v25, %v891_v21 }
  0x14   : > { %1179 = vmatpush.bf16.msra.mxu1 %v1144_v4  ;;  %1180 = vmatpush.bf16.msra.mxu2 %v1144_v4  ;;  %v1161_v29 = vld [vmem:[%s1464_s1 + $0xb0] sm:$0xff]  ;;  %v904_v32 = vor.u32 %v1120_v26, %v901_v27  ;;  %v1160_v34 = vld [vmem:[%s1464_s1 + $0xa8] sm:$0xff]  ;;  %v1159_v37 = vld [vmem:[%s1464_s1 + $0xa0] sm:$0xff] }
  0x15   : > { %632 = vmatpush.bf16.msra.mxu0 %v1144_v4  ;;  %719 = vmatpush.bf16.msra.mxu3 %v1168_v5  ;;  %v1153_v30 = vld [vmem:[%s1464_s1 + $0x70] sm:$0xff]  ;;  %v1152_v35 = vld [vmem:[%s1464_s1 + $0x68] sm:$0xff]  ;;  %v1151_v38 = vld [vmem:[%s1464_s1 + $0x60] sm:$0xff] }
  0x16   : > { %v1173_v33 = vld [vmem:[%s1464_s1 + $0x110] sm:$0xff]  ;;  %v1172_v36 = vld [vmem:[%s1464_s1 + $0x108] sm:$0xff]  ;;  %v1131_v40 = vld [vmem:[%s1288_s22 + $0x60] sm:$0xf0] }
  0x17   : > { %v931_v39 = vld [vmem:[%s1288_s22 + $0x50] sm:$0xf]  ;;  %v1171_v41 = vld [vmem:[%s1464_s1 + $0x100] sm:$0xff]  ;;  %v1158_v42 = vld [vmem:[%s1464_s1 + $0x98] sm:$0xff] }
  0x18   : > { %1181 = vmatpush.bf16.msra.mxu1 %v1143_v6  ;;  %1182 = vmatpush.bf16.msra.mxu2 %v1143_v6  ;;  %v1150_v43 = vld [vmem:[%s1464_s1 + $0x58] sm:$0xff]  ;;  %v907_v44 = vld [vmem:[%s1288_s22 + $0x10] sm:$0xf]  ;;  %v932_v45 = vor.u32 %v1131_v40, %v931_v39  ;;  %v1123_v46 = vld [vmem:[%s1288_s22 + $0x20] sm:$0xf0] }
  0x19   : > { %633 = vmatpush.bf16.msra.mxu0 %v1143_v6  ;;  %720 = vmatpush.bf16.msra.mxu3 %v1167_v7  ;;  %v1125_v47 = vld [vmem:[%s1288_s22 + $0x34] sm:$0xf]  ;;  %v921_v48 = vld [vmem:[%s1288_s22 + $0x44] sm:$0xf0]  ;;  %v908_v51 = vor.u32 %v1123_v46, %v907_v44  ;;  %v1155_v55 = vld [vmem:[%s1464_s1 + $0x80] sm:$0xff] }
  0x1a   : > { %v1157_v49 = vld [vmem:[%s1464_s1 + $0x90] sm:$0xff]  ;;  %v924_v52 = vor.u32 %v1125_v47, %v921_v48  ;;  %v1156_v53 = vld [vmem:[%s1464_s1 + $0x88] sm:$0xff]  ;;  %v1147_v56 = vld [vmem:[%s1464_s1 + $0x40] sm:$0xff] }
  0x1b   : > { %v1149_v50 = vld [vmem:[%s1464_s1 + $0x50] sm:$0xff]  ;;  %v1148_v54 = vld [vmem:[%s1464_s1 + $0x48] sm:$0xff]  ;;  %v1122_v58 = vld [vmem:[%s1288_s22 + $0x18] sm:$0xf0] }
  0x1c   : > { %1183 = vmatpush.bf16.msra.mxu1 %v1142_v8  ;;  %1184 = vmatpush.bf16.msra.mxu2 %v1142_v8  ;;  %v899_v57 = vld [vmem:[%s1288_s22 + $0x8] sm:$0xf]  ;;  %v1119_v60 = vld [vmem:[%s1288_s22 + $0x4] sm:$0xf]  ;;  %v893_v61 = vld [vmem:[%s1288_s22 + $0x14] sm:$0xf0] }
  0x1d   : > { %634 = vmatpush.bf16.msra.mxu0 %v1142_v8  ;;  %721 = vmatpush.bf16.msra.mxu3 %v1166_v9  ;;  %v900_v59 = vor.u32 %v1122_v58, %v899_v57  ;;  %v927_v62 = vld [vmem:[%s1288_s22 + $0x38] sm:$0xf]  ;;  %v896_v63 = vor.u32 %v1119_v60, %v893_v61  ;;  %v1128_v0 = vld [vmem:[%s1288_s22 + $0x48] sm:$0xf0]  ;;  %v1130_v1 = vld [vmem:[%s1288_s22 + $0x5c] sm:$0xf] }
  0x1e   : > { %v941_v2 = vld [vmem:[%s1288_s22 + $0x6c] sm:$0xf0]  ;;  %v928_v3 = vor.u32 %v1128_v0, %v927_v62  ;;  %v1127_v6 = vld [vmem:[%s1288_s22 + $0x40] sm:$0xf0]  ;;  %v1124_v8 = vld [vmem:[%s1288_s22 + $0x2c] sm:$0xf] }
  0x1f   : > { %v944_v4 = vor.u32 %v1130_v1, %v941_v2  ;;  %v919_v5 = vld [vmem:[%s1288_s22 + $0x30] sm:$0xf]  ;;  %v913_v9 = vld [vmem:[%s1288_s22 + $0x3c] sm:$0xf0]  ;;  %v939_v17 = vld [vmem:[%s1288_s22 + $0x58] sm:$0xf] }
  0x20   : > { %1185 = vmatpush.bf16.msra.mxu1 %v1141_v10  ;;  %1186 = vmatpush.bf16.msra.mxu2 %v1141_v10  ;;  %v920_v7 = vor.u32 %v1127_v6, %v919_v5  ;;  %v1132_v18 = vld [vmem:[%s1288_s22 + $0x68] sm:$0xf0]  ;;  %v933_v21 = vld [vmem:[%s1288_s22 + $0x64] sm:$0xf0]  ;;  %v959_v26 = vld [vmem:[%s1288_s22 + $0x80] sm:$0xf] }
  0x21   : > { %635 = vmatpush.bf16.msra.mxu0 %v1141_v10  ;;  %722 = vmatpush.bf16.msra.mxu3 %v1165_v11  ;;  %v947_v10 = vld [vmem:[%s1288_s22 + $0x60] sm:$0xf]  ;;  %v916_v11 = vor.u32 %v1124_v8, %v913_v9  ;;  %v1137_v27 = vld [vmem:[%s1288_s22 + $0x90] sm:$0xf0] }
  0x24   : > { %1187 = vmatpush.bf16.msra.mxu1 %v1140_v12  ;;  %1188 = vmatpush.bf16.msra.mxu2 %v1140_v12 }
  0x25   : > { %636 = vmatpush.bf16.msra.mxu0 %v1140_v12  ;;  %723 = vmatpush.bf16.msra.mxu3 %v1164_v13  ;;  %v1133_v12 = vld [vmem:[%s1288_s22 + $0x70] sm:$0xf0]  ;;  %v1135_v13 = vld [vmem:[%s1288_s22 + $0x84] sm:$0xf] }
  0x26   : > { %v948_v15 = vor.u32 %v1133_v12, %v947_v10 }
  0x28   : > { %1189 = vmatpush.bf16.msra.mxu1 %v1139_v14  ;;  %1190 = vmatpush.bf16.msra.mxu2 %v1139_v14 }
  0x29   : > { %637 = vmatpush.bf16.msra.mxu0 %v1139_v14  ;;  %724 = vmatpush.bf16.msra.mxu3 %v1163_v22  ;;  %v961_v14 = vld [vmem:[%s1288_s22 + $0x94] sm:$0xf0] }
  0x2a   : > { %v964_v16 = vor.u32 %v1135_v13, %v961_v14 }
  0x2b   : > { %643 = vmatmul.bf16.vlgmr.msra.gmra.mxu1 %v912_v23  ;;  %653 = vmatmul.bf16.vlgmr.msra.gmra.mxu2 %v952_v24  ;;  %v967_v23 = vld [vmem:[%s1288_s22 + $0x88] sm:$0xf]  ;;  %v1138_v24 = vld [vmem:[%s1288_s22 + $0x98] sm:$0xf0] }
  0x2c   : > { %688 = vmatpush.bf16.msrb.mxu2 %v1162_v19  ;;  %659 = vmatpush.bf16.msrb.mxu1 %v1154_v20  ;;  %v940_v19 = vor.u32 %v1132_v18, %v939_v17  ;;  %v1129_v20 = vld [vmem:[%s1288_s22 + $0x54] sm:$0xf]  ;;  %v968_v25 = vor.u32 %v1138_v24, %v967_v23 }
  0x2d   : > { %750 = vmatpush.bf16.msrb.mxu0 %v1174_v28  ;;  %725 = vmatmul.bf16.vlgmr.msra.gmra.mxu3 %v904_v32  ;;  %v936_v22 = vor.u32 %v1129_v20, %v933_v21  ;;  %v960_v28 = vor.u32 %v1137_v27, %v959_v26 }
  0x2e   : > { %638 = vmatmul.bf16.vlgmr.msra.gmra.mxu0 %v892_v31 }
  0x30   : > { %689 = vmatpush.bf16.msrb.mxu2 %v1161_v29  ;;  %660 = vmatpush.bf16.msrb.mxu1 %v1153_v30  ;;  %v1134_v29 = vld [vmem:[%s1288_s22 + $0x7c] sm:$0xf]  ;;  %v953_v30 = vld [vmem:[%s1288_s22 + $0x8c] sm:$0xf0] }
  0x31   : > { %751 = vmatpush.bf16.msrb.mxu0 %v1173_v33  ;;  %v956_v31 = vor.u32 %v1134_v29, %v953_v30 }
  0x34   : > { %690 = vmatpush.bf16.msrb.mxu2 %v1160_v34  ;;  %661 = vmatpush.bf16.msrb.mxu1 %v1152_v35 }
  0x35   : > { %752 = vmatpush.bf16.msrb.mxu0 %v1172_v36 }
  0x38   : > { %691 = vmatpush.bf16.msrb.mxu2 %v1159_v37  ;;  %662 = vmatpush.bf16.msrb.mxu1 %v1151_v38 }
  0x39   : > { %753 = vmatpush.bf16.msrb.mxu0 %v1171_v41 }
  0x3b   : > { %648 = vmatmul.bf16.gmra.mxu1 %v932_v45 }
  0x3c   : > { %692 = vmatpush.bf16.msrb.mxu2 %v1158_v42  ;;  %663 = vmatpush.bf16.msrb.mxu1 %v1150_v43 }
  0x3d   : > { %730 = vmatmul.bf16.gmra.mxu3 %v924_v52 }
  0x3e   : > { %1113 = vmatmul.msk.bf16.vlgmr.msrb.gmra.mxu0 %vm617_vm0, %v908_v51  ;;  %v1417_v51 = vld [vmem:[%s1466_s3] ss:$0 sm:$0xff] }
  0x40   : > { %693 = vmatpush.bf16.msrb.mxu2 %v1157_v49  ;;  %664 = vmatpush.bf16.msrb.mxu1 %v1149_v50  ;;  %v1412_v49 = vld [vmem:[%s1465_s2] ss:$0 sm:$0xff] }
  0x44   : > { %694 = vmatpush.bf16.msrb.mxu2 %v1156_v53  ;;  %665 = vmatpush.bf16.msrb.mxu1 %v1148_v54 }
  0x48   : > { %695 = vmatpush.bf16.msrb.mxu2 %v1155_v55  ;;  %666 = vmatpush.bf16.msrb.mxu1 %v1147_v56 }
  0x4b   : > { %696 = vmatmul.bf16.vlgmr.msrb.gmra.mxu2 %v900_v59  ;;  %667 = vmatmul.bf16.vlgmr.msrb.gmra.mxu1 %v896_v63 }
  0x4d   : > { %735 = vmatmul.bf16.gmra.mxu3 %v944_v4 }
  0x4e   : > { %1114 = vmatmul.msk.bf16.gmra.mxu0 %vm617_vm0, %v928_v3 }
  0x5b   : > { %701 = vmatmul.bf16.gmra.mxu2 %v920_v7  ;;  %672 = vmatmul.bf16.gmra.mxu1 %v916_v11 }
  0x5d   : > { %740 = vmatmul.bf16.gmra.mxu3 %v964_v16 }
  0x5e   : > { %1115 = vmatmul.msk.bf16.gmra.mxu0 %vm617_vm0, %v948_v15 }
  0x6b   : > { %706 = vmatmul.bf16.gmra.mxu2 %v940_v19  ;;  %677 = vmatmul.bf16.gmra.mxu1 %v936_v22 }
  0x6e   : > { %1116 = vmatmul.msk.bf16.gmra.mxu0 %vm617_vm0, %v968_v25 }
  0x7b   : > { %711 = vmatmul.bf16.gmra.mxu2 %v960_v28  ;;  %682 = vmatmul.bf16.gmra.mxu1 %v956_v31 }
  0xa8   : > { %v644_v32 = vpop.f32.mrf.mxu1 }
  0xab   : > { %v639_v33 = vpop.f32.mrf.mxu0 }
  0xae   : > { %v1403_v37 = vpop.f32.mrf.mxu2 }
  0xb0   : > { %v646_v34 = vpop.f32.mrf.mxu1  ;;  %v726_v38 = vpop.f32.mrf.mxu3 }
  0xb3   : > { %v641_v35 = vpop.f32.mrf.mxu0 }
  0xb6   : > { %v1407_v41 = vpop.f32.mrf.mxu2 }
  0xb8   : > { %v649_v36 = vpop.f32.mrf.mxu1  ;;  %v728_v44 = vpop.f32.mrf.mxu3 }
  0xbb   : > { %v755_v40 = vpop.f32.mrf.mxu0 }
  0xc0   : > { %v1405_v39 = vpop.f32.mrf.mxu1  ;;  %v731_v56 = vpop.f32.mrf.mxu3 }
  0xc3   : > { %v757_v46 = vpop.f32.mrf.mxu0 }
  0xc8   : > { %v668_v42 = vpop.f32.mrf.mxu1  ;;  %v733_v6 = vpop.f32.mrf.mxu3 }
  0xc9   : > { %v669_v43 = vadd.f32 %v668_v42, %v639_v33 }
  0xcb   : > { %v760_v59 = vpop.f32.mrf.mxu0 }
  0xce   : > { %v697_v45 = vpop.f32.mrf.mxu2 }
  0xcf   : > { %v698_v47 = vadd.f32 %v697_v45, %v669_v43 }
  0xd0   : > { %v670_v52 = vpop.f32.mrf.mxu1  ;;  %v736_v20 = vpop.f32.mrf.mxu3 }
  0xd1   : > { %v727_v48 = vadd.f32 %v726_v38, %v698_v47  ;;  %v671_v53 = vadd.f32 %v670_v52, %v641_v35 }
  0xd3   : > { %v756_v50 = vadd.f32 %v755_v40, %v727_v48  ;;  %v762_v9 = vpop.f32.mrf.mxu0 }
  0xd5   : > { %v779_v54 = vmul.f32 %v1412_v49, %v756_v50 }
  0xd6   : > { %v699_v55 = vpop.f32.mrf.mxu2 }
  0xd7   : > { %v791_v57 = vadd.f32 %v1417_v51, %v779_v54  ;;  %v700_v58 = vadd.f32 %v699_v55, %v671_v53 }
  0xd8   : > { %v673_v0 = vpop.f32.mrf.mxu1  ;;  %v738_v35 = vpop.f32.mrf.mxu3 }
  0xd9   : > { %v799_v60 = vmax.f32 %v791_v57, 0.0  ;;  %v729_v61 = vadd.f32 %v728_v44, %v700_v58  ;;  %v674_v1 = vadd.f32 %v673_v0, %v644_v32 }
  0xdb   : > { %v807_v62 = vpack.c.bf16 %v799_v60, %v799_v60  ;;  %v758_v63 = vadd.f32 %v757_v46, %v729_v61  ;;  %v765_v24 = vpop.f32.mrf.mxu0 }
  0xdd   : > { %816 = vst.msk [vmem:[%s1425_s30] sm:$0xf] %vm815_vm1, %v807_v62  ;;  %v780_v2 = vmul.f32 %v1412_v49, %v758_v63 }
  0xde   : > { %v702_v3 = vpop.f32.mrf.mxu2 }
  0xdf   : > { %v792_v4 = vadd.f32 %v1417_v51, %v780_v2  ;;  %v703_v5 = vadd.f32 %v702_v3, %v674_v1 }
  0xe0   : > { %v675_v12 = vpop.f32.mrf.mxu1  ;;  %v741_v53 = vpop.f32.mrf.mxu3 }
  0xe1   : > { %v800_v7 = vmax.f32 %v792_v4, 0.0  ;;  %v732_v8 = vadd.f32 %v731_v56, %v703_v5  ;;  %v676_v13 = vadd.f32 %v675_v12, %v646_v34 }
  0xe3   : > { %v808_v10 = vpack.c.bf16 %v800_v7, %v800_v7  ;;  %v761_v11 = vadd.f32 %v760_v59, %v732_v8  ;;  %v767_v40 = vpop.f32.mrf.mxu0 }
  0xe5   : > { %817 = vst.msk [vmem:[%s1425_s30 + $0x4] sm:$0xf] %vm815_vm1, %v808_v10  ;;  %v781_v14 = vmul.f32 %v1412_v49, %v761_v11 }
  0xe6   : > { %v704_v15 = vpop.f32.mrf.mxu2 }
  0xe7   : > { %v793_v16 = vadd.f32 %v1417_v51, %v781_v14  ;;  %v705_v17 = vadd.f32 %v704_v15, %v676_v13 }
  0xe8   : > { %v678_v23 = vpop.f32.mrf.mxu1  ;;  %v743_v3 = vpop.f32.mrf.mxu3 }
  0xe9   : > { %v801_v18 = vmax.f32 %v793_v16, 0.0  ;;  %v734_v19 = vadd.f32 %v733_v6, %v705_v17  ;;  %v679_v25 = vadd.f32 %v678_v23, %v649_v36 }
  0xeb   : > { %v809_v21 = vpack.c.bf16 %v801_v18, %v801_v18  ;;  %v763_v22 = vadd.f32 %v762_v9, %v734_v19  ;;  %v770_v57 = vpop.f32.mrf.mxu0 }
  0xed   : > { %818 = vst.msk [vmem:[%s1425_s30 + $0x8] sm:$0xf] %vm815_vm1, %v809_v21  ;;  %v782_v26 = vmul.f32 %v1412_v49, %v763_v22 }
  0xee   : > { %v707_v27 = vpop.f32.mrf.mxu2 }
  0xef   : > { %v794_v28 = vadd.f32 %v1417_v51, %v782_v26  ;;  %v708_v29 = vadd.f32 %v707_v27, %v679_v25 }
  0xf0   : > { %v680_v34 = vpop.f32.mrf.mxu1 }
  0xf1   : > { %v802_v30 = vmax.f32 %v794_v28, 0.0  ;;  %v737_v31 = vadd.f32 %v736_v20, %v708_v29  ;;  %v681_v38 = vadd.f32 %v680_v34, %v1405_v39 }
  0xf3   : > { %v810_v32 = vpack.c.bf16 %v802_v30, %v802_v30  ;;  %v766_v33 = vadd.f32 %v765_v24, %v737_v31  ;;  %v772_v6 = vpop.f32.mrf.mxu0 }
  0xf5   : > { %819 = vst.msk [vmem:[%s1425_s30 + $0xc] sm:$0xf] %vm815_vm1, %v810_v32  ;;  %v783_v36 = vmul.f32 %v1412_v49, %v766_v33 }
  0xf6   : > { %v709_v42 = vpop.f32.mrf.mxu2 }
  0xf7   : > { %v795_v43 = vadd.f32 %v1417_v51, %v783_v36  ;;  %v710_v44 = vadd.f32 %v709_v42, %v681_v38 }
  0xf8   : > { %v683_v50 = vpop.f32.mrf.mxu1 }
  0xf9   : > { %v803_v45 = vmax.f32 %v795_v43, 0.0  ;;  %v739_v46 = vadd.f32 %v738_v35, %v710_v44  ;;  %v684_v52 = vadd.f32 %v683_v50, %v1403_v37 }
  0xfb   : > { %v811_v47 = vpack.c.bf16 %v803_v45, %v803_v45  ;;  %v768_v48 = vadd.f32 %v767_v40, %v739_v46 }
  0xfd   : > { %820 = vst.msk [vmem:[%s1425_s30 + $0x10] sm:$0xf] %vm815_vm1, %v811_v47  ;;  %v784_v39 = vmul.f32 %v1412_v49, %v768_v48 }
  0xfe   : > { %v712_v54 = vpop.f32.mrf.mxu2 }
  0xff   : > { %v796_v55 = vadd.f32 %v1417_v51, %v784_v39  ;;  %v713_v56 = vadd.f32 %v712_v54, %v684_v52 }
 0x100   : > { %v685_v62 = vpop.f32.mrf.mxu1 }
 0x101   : > { %v804_v58 = vmax.f32 %v796_v55, 0.0  ;;  %v742_v59 = vadd.f32 %v741_v53, %v713_v56  ;;  %v686_v63 = vadd.f32 %v685_v62, %v1407_v41 }
 0x103   : > { %v812_v60 = vpack.c.bf16 %v804_v58, %v804_v58  ;;  %v771_v61 = vadd.f32 %v770_v57, %v742_v59 }
 0x105   : > { %821 = vst.msk [vmem:[%s1425_s30 + $0x14] sm:$0xf] %vm815_vm1, %v812_v60  ;;  %v785_v37 = vmul.f32 %v1412_v49, %v771_v61 }
 0x106   : > { %v714_v0 = vpop.f32.mrf.mxu2 }
 0x107   : > { %v797_v1 = vadd.f32 %v1417_v51, %v785_v37  ;;  %v715_v2 = vadd.f32 %v714_v0, %v686_v63 }
 0x109   : > { %v805_v4 = vmax.f32 %v797_v1, 0.0  ;;  %v744_v5 = vadd.f32 %v743_v3, %v715_v2 }
 0x10b   : > { %v813_v7 = vpack.c.bf16 %v805_v4, %v805_v4  ;;  %v773_v8 = vadd.f32 %v772_v6, %v744_v5 }
 0x10d   : > { %822 = vst.msk [vmem:[%s1425_s30 + $0x18] sm:$0xf] %vm815_vm1, %v813_v7  ;;  %v786_v9 = vmul.f32 %v1412_v49, %v773_v8 }
 0x10f   : > { %v798_v41 = vadd.f32 %v1417_v51, %v786_v9 }
 0x111   : > { %v806_v10 = vmax.f32 %v798_v41, 0.0 }
 0x113   : > { %v814_v11 = vpack.c.bf16 %v806_v10, %v806_v10 }
 0x115   : > { %823 = vst.msk [vmem:[%s1425_s30 + $0x1c] sm:$0xf] %vm815_vm1, %v814_v11 }
 0x116 PF: > { %s14_s15 = sadd.s32 1, %s1208_s15  }
 0x117   : > { %p11_p4 = scmp.ge.s32.totalorder %s14_s15, 4  }
 0x119   :  { %13 = sbr.rel (!%p11_p4) target bundleno = 1 (0x1), region = 66 }

// kernel: resnet_forward.7
= control target key start
LH: loop header
LB: loop body
LE: loop exit
PB: predicated region body
PF: predicated region fallthrough
CT: control target
= control target key end

     0   :  { %s1346_s18 = smov 0   ;;  %s1586_s0 = inlined_call_operand.vmem [shape: bf16[128,576], index: 0, kind: input, shape index: {}]   ;;  %s1587_s1 = inlined_call_operand.vmem [shape: bf16[576,64], index: 1, kind: input, shape index: {}]   ;;  %s1588_s2 = inlined_call_operand.vmem [shape: f32[1,64], index: 2, kind: input, shape index: {}]   ;;  %s1589_s3 = inlined_call_operand.vmem [shape: f32[1,64], index: 3, kind: input, shape index: {}]   ;;  %s1590_s4 = inlined_call_operand.vmem [shape: bf16[128,64], index: 4, kind: input, shape index: {}]   ;;  %s1591_s5 = inlined_call_operand.vmem [shape: bf16[128,64], index: 5, kind: output, shape index: {}]  }
   0x1 LB: > { %s965_s19 = sadd.s32 4294967295, %s1314_s18   ;;  %p969_p0 = scmp.ge.s32.totalorder %s1314_s18, 1  ;;  %s1314_s18 = sphi %s1346_s18, %s15_s18  }
   0x2   : > { %p200_p1 = scmp.lt.s32.totalorder %s1314_s18, 3 }
   0x4   : > { %p201_p2 = pnand %p969_p0, %p200_p1 }
   0x5   : > { %s970_s30 = sshll.u32 (!%p201_p2), %s965_s19, 3 }
   0x6   : > { %204 = sbr.rel (%p201_p2) target bundleno = 280 (0x118), region = 40  ;;  %p235_p3 = scmp.lt.s32.totalorder (!%p201_p2), %s970_s30, 15 }
   0xb   : > { %v1233_v0 = vld [vmem:[%s1587_s1 + $0x38] sm:$0xff]  ;;  %v1232_v1 = vld [vmem:[%s1587_s1 + $0x30] sm:$0xff]  ;;  %v1231_v4 = vld [vmem:[%s1587_s1 + $0x28] sm:$0xff]  ;;  %s1593_s30 = smov (!%p235_p3, %s970_s30), 15  ;;  %vm666_vm0 = vcmask 523264   ;;  %vm888_vm1 = vcmask 519168  }
   0xc   : > { %1281 = vmatpush.bf16.msra.mxu1 %v1233_v0  ;;  %1282 = vmatpush.bf16.msra.mxu2 %v1233_v0  ;;  %v1257_v2 = vld [vmem:[%s1587_s1 + $0xf8] sm:$0xff]  ;;  %v1256_v3 = vld [vmem:[%s1587_s1 + $0xf0] sm:$0xff]  ;;  %v1255_v5 = vld [vmem:[%s1587_s1 + $0xe8] sm:$0xff]  ;;  %s1297_s19 = smul.u32 20, %s1593_s30 }
   0xd   : > { %679 = vmatpush.bf16.msra.mxu0 %v1233_v0  ;;  %766 = vmatpush.bf16.msra.mxu3 %v1257_v2  ;;  %v1230_v6 = vld [vmem:[%s1587_s1 + $0x20] sm:$0xff]  ;;  %v1229_v8 = vld [vmem:[%s1587_s1 + $0x18] sm:$0xff]  ;;  %v1228_v10 = vld [vmem:[%s1587_s1 + $0x10] sm:$0xff] }
   0xe   : > { %v1254_v7 = vld [vmem:[%s1587_s1 + $0xe0] sm:$0xff]  ;;  %v1253_v9 = vld [vmem:[%s1587_s1 + $0xd8] sm:$0xff]  ;;  %v1252_v11 = vld [vmem:[%s1587_s1 + $0xd0] sm:$0xff]  ;;  %s1399_s26 = scalar_lea.vmem %s1586_s0, %s1297_s19 }
   0xf   : > { %v1227_v12 = vld [vmem:[%s1587_s1 + $0x8] sm:$0xff]  ;;  %v1226_v14 = vld [vmem:[%s1587_s1] sm:$0xff]  ;;  %v1213_v16 = vld [vmem:[%s1399_s26 + $0x38] sm:$0xf0] }
  0x10   : > { %1283 = vmatpush.bf16.msra.mxu1 %v1232_v1  ;;  %1284 = vmatpush.bf16.msra.mxu2 %v1232_v1  ;;  %v1251_v13 = vld [vmem:[%s1587_s1 + $0xc8] sm:$0xff]  ;;  %v1038_v17 = vld [vmem:[%s1399_s26 + $0x78] sm:$0xf]  ;;  %v978_v21 = vld [vmem:[%s1399_s26] sm:$0xf] }
  0x11   : > { %680 = vmatpush.bf16.msra.mxu0 %v1232_v1  ;;  %767 = vmatpush.bf16.msra.mxu3 %v1256_v3  ;;  %v998_v15 = vld [vmem:[%s1399_s26 + $0x28] sm:$0xf]  ;;  %v1223_v18 = vld [vmem:[%s1399_s26 + $0x88] sm:$0xf0]  ;;  %v1249_v19 = vld [vmem:[%s1587_s1 + $0xb8] sm:$0xff] }
  0x12   : > { %v1241_v20 = vld [vmem:[%s1587_s1 + $0x78] sm:$0xff]  ;;  %v1250_v22 = vld [vmem:[%s1587_s1 + $0xc0] sm:$0xff]  ;;  %v999_v23 = vor.u32 %v1213_v16, %v998_v15  ;;  %v1039_v24 = vor.u32 %v1223_v18, %v1038_v17  ;;  %v1208_v25 = vld [vmem:[%s1399_s26 + $0x10] sm:$0xf0] }
  0x13   : > { %v1207_v26 = vld [vmem:[%s1399_s26 + $0xc] sm:$0xf]  ;;  %v988_v27 = vld [vmem:[%s1399_s26 + $0x1c] sm:$0xf0]  ;;  %v1261_v28 = vld [vmem:[%s1587_s1 + $0x118] sm:$0xff]  ;;  %v979_v31 = vor.u32 %v1208_v25, %v978_v21 }
  0x14   : > { %1285 = vmatpush.bf16.msra.mxu1 %v1231_v4  ;;  %1286 = vmatpush.bf16.msra.mxu2 %v1231_v4  ;;  %v1248_v29 = vld [vmem:[%s1587_s1 + $0xb0] sm:$0xff]  ;;  %v991_v32 = vor.u32 %v1207_v26, %v988_v27  ;;  %v1247_v34 = vld [vmem:[%s1587_s1 + $0xa8] sm:$0xff]  ;;  %v1246_v37 = vld [vmem:[%s1587_s1 + $0xa0] sm:$0xff] }
  0x15   : > { %681 = vmatpush.bf16.msra.mxu0 %v1231_v4  ;;  %768 = vmatpush.bf16.msra.mxu3 %v1255_v5  ;;  %v1240_v30 = vld [vmem:[%s1587_s1 + $0x70] sm:$0xff]  ;;  %v1239_v35 = vld [vmem:[%s1587_s1 + $0x68] sm:$0xff]  ;;  %v1238_v38 = vld [vmem:[%s1587_s1 + $0x60] sm:$0xff] }
  0x16   : > { %v1260_v33 = vld [vmem:[%s1587_s1 + $0x110] sm:$0xff]  ;;  %v1259_v36 = vld [vmem:[%s1587_s1 + $0x108] sm:$0xff]  ;;  %v1218_v40 = vld [vmem:[%s1399_s26 + $0x60] sm:$0xf0] }
  0x17   : > { %v1018_v39 = vld [vmem:[%s1399_s26 + $0x50] sm:$0xf]  ;;  %v1258_v41 = vld [vmem:[%s1587_s1 + $0x100] sm:$0xff]  ;;  %v1245_v42 = vld [vmem:[%s1587_s1 + $0x98] sm:$0xff] }
  0x18   : > { %1287 = vmatpush.bf16.msra.mxu1 %v1230_v6  ;;  %1288 = vmatpush.bf16.msra.mxu2 %v1230_v6  ;;  %v1237_v43 = vld [vmem:[%s1587_s1 + $0x58] sm:$0xff]  ;;  %v994_v44 = vld [vmem:[%s1399_s26 + $0x10] sm:$0xf]  ;;  %v1019_v45 = vor.u32 %v1218_v40, %v1018_v39  ;;  %v1210_v46 = vld [vmem:[%s1399_s26 + $0x20] sm:$0xf0] }
  0x19   : > { %682 = vmatpush.bf16.msra.mxu0 %v1230_v6  ;;  %769 = vmatpush.bf16.msra.mxu3 %v1254_v7  ;;  %v1212_v47 = vld [vmem:[%s1399_s26 + $0x34] sm:$0xf]  ;;  %v1008_v48 = vld [vmem:[%s1399_s26 + $0x44] sm:$0xf0]  ;;  %v995_v51 = vor.u32 %v1210_v46, %v994_v44  ;;  %v1242_v55 = vld [vmem:[%s1587_s1 + $0x80] sm:$0xff] }
  0x1a   : > { %v1244_v49 = vld [vmem:[%s1587_s1 + $0x90] sm:$0xff]  ;;  %v1011_v52 = vor.u32 %v1212_v47, %v1008_v48  ;;  %v1243_v53 = vld [vmem:[%s1587_s1 + $0x88] sm:$0xff]  ;;  %v1234_v56 = vld [vmem:[%s1587_s1 + $0x40] sm:$0xff] }
  0x1b   : > { %v1236_v50 = vld [vmem:[%s1587_s1 + $0x50] sm:$0xff]  ;;  %v1235_v54 = vld [vmem:[%s1587_s1 + $0x48] sm:$0xff]  ;;  %v1209_v58 = vld [vmem:[%s1399_s26 + $0x18] sm:$0xf0] }
  0x1c   : > { %1289 = vmatpush.bf16.msra.mxu1 %v1229_v8  ;;  %1290 = vmatpush.bf16.msra.mxu2 %v1229_v8  ;;  %v986_v57 = vld [vmem:[%s1399_s26 + $0x8] sm:$0xf]  ;;  %v1206_v60 = vld [vmem:[%s1399_s26 + $0x4] sm:$0xf]  ;;  %v980_v61 = vld [vmem:[%s1399_s26 + $0x14] sm:$0xf0] }
  0x1d   : > { %683 = vmatpush.bf16.msra.mxu0 %v1229_v8  ;;  %770 = vmatpush.bf16.msra.mxu3 %v1253_v9  ;;  %v987_v59 = vor.u32 %v1209_v58, %v986_v57  ;;  %v1014_v62 = vld [vmem:[%s1399_s26 + $0x38] sm:$0xf]  ;;  %v983_v63 = vor.u32 %v1206_v60, %v980_v61  ;;  %v1215_v0 = vld [vmem:[%s1399_s26 + $0x48] sm:$0xf0]  ;;  %v1217_v1 = vld [vmem:[%s1399_s26 + $0x5c] sm:$0xf] }
  0x1e   : > { %v1028_v2 = vld [vmem:[%s1399_s26 + $0x6c] sm:$0xf0]  ;;  %v1015_v3 = vor.u32 %v1215_v0, %v1014_v62  ;;  %v1214_v6 = vld [vmem:[%s1399_s26 + $0x40] sm:$0xf0]  ;;  %v1211_v8 = vld [vmem:[%s1399_s26 + $0x2c] sm:$0xf] }
  0x1f   : > { %v1031_v4 = vor.u32 %v1217_v1, %v1028_v2  ;;  %v1006_v5 = vld [vmem:[%s1399_s26 + $0x30] sm:$0xf]  ;;  %v1000_v9 = vld [vmem:[%s1399_s26 + $0x3c] sm:$0xf0]  ;;  %v1026_v17 = vld [vmem:[%s1399_s26 + $0x58] sm:$0xf] }
  0x20   : > { %1291 = vmatpush.bf16.msra.mxu1 %v1228_v10  ;;  %1292 = vmatpush.bf16.msra.mxu2 %v1228_v10  ;;  %v1007_v7 = vor.u32 %v1214_v6, %v1006_v5  ;;  %v1219_v18 = vld [vmem:[%s1399_s26 + $0x68] sm:$0xf0]  ;;  %v1020_v21 = vld [vmem:[%s1399_s26 + $0x64] sm:$0xf0]  ;;  %v1046_v26 = vld [vmem:[%s1399_s26 + $0x80] sm:$0xf] }
  0x21   : > { %684 = vmatpush.bf16.msra.mxu0 %v1228_v10  ;;  %771 = vmatpush.bf16.msra.mxu3 %v1252_v11  ;;  %v1034_v10 = vld [vmem:[%s1399_s26 + $0x60] sm:$0xf]  ;;  %v1003_v11 = vor.u32 %v1211_v8, %v1000_v9  ;;  %v1224_v27 = vld [vmem:[%s1399_s26 + $0x90] sm:$0xf0] }
  0x24   : > { %1293 = vmatpush.bf16.msra.mxu1 %v1227_v12  ;;  %1294 = vmatpush.bf16.msra.mxu2 %v1227_v12 }
  0x25   : > { %685 = vmatpush.bf16.msra.mxu0 %v1227_v12  ;;  %772 = vmatpush.bf16.msra.mxu3 %v1251_v13  ;;  %v1220_v12 = vld [vmem:[%s1399_s26 + $0x70] sm:$0xf0]  ;;  %v1222_v13 = vld [vmem:[%s1399_s26 + $0x84] sm:$0xf] }
  0x26   : > { %v1035_v15 = vor.u32 %v1220_v12, %v1034_v10 }
  0x28   : > { %1295 = vmatpush.bf16.msra.mxu1 %v1226_v14  ;;  %1296 = vmatpush.bf16.msra.mxu2 %v1226_v14 }
  0x29   : > { %686 = vmatpush.bf16.msra.mxu0 %v1226_v14  ;;  %773 = vmatpush.bf16.msra.mxu3 %v1250_v22  ;;  %v1048_v14 = vld [vmem:[%s1399_s26 + $0x94] sm:$0xf0] }
  0x2a   : > { %v1051_v16 = vor.u32 %v1222_v13, %v1048_v14 }
  0x2b   : > { %692 = vmatmul.bf16.vlgmr.msra.gmra.mxu1 %v999_v23  ;;  %702 = vmatmul.bf16.vlgmr.msra.gmra.mxu2 %v1039_v24  ;;  %v1054_v23 = vld [vmem:[%s1399_s26 + $0x88] sm:$0xf]  ;;  %v1225_v24 = vld [vmem:[%s1399_s26 + $0x98] sm:$0xf0] }
  0x2c   : > { %737 = vmatpush.bf16.msrb.mxu2 %v1249_v19  ;;  %708 = vmatpush.bf16.msrb.mxu1 %v1241_v20  ;;  %v1027_v19 = vor.u32 %v1219_v18, %v1026_v17  ;;  %v1216_v20 = vld [vmem:[%s1399_s26 + $0x54] sm:$0xf]  ;;  %v1055_v25 = vor.u32 %v1225_v24, %v1054_v23 }
  0x2d   : > { %799 = vmatpush.bf16.msrb.mxu0 %v1261_v28  ;;  %774 = vmatmul.bf16.vlgmr.msra.gmra.mxu3 %v991_v32  ;;  %v1023_v22 = vor.u32 %v1216_v20, %v1020_v21  ;;  %v1047_v28 = vor.u32 %v1224_v27, %v1046_v26 }
  0x2e   : > { %687 = vmatmul.bf16.vlgmr.msra.gmra.mxu0 %v979_v31 }
  0x30   : > { %738 = vmatpush.bf16.msrb.mxu2 %v1248_v29  ;;  %709 = vmatpush.bf16.msrb.mxu1 %v1240_v30  ;;  %v1221_v29 = vld [vmem:[%s1399_s26 + $0x7c] sm:$0xf]  ;;  %v1040_v30 = vld [vmem:[%s1399_s26 + $0x8c] sm:$0xf0]  ;;  %s973_s26 = sshll.u32 %s1593_s30, 2 }
  0x31   : > { %800 = vmatpush.bf16.msrb.mxu0 %v1260_v33  ;;  %v1043_v31 = vor.u32 %v1221_v29, %v1040_v30  ;;  %s1526_s7 = scalar_lea.vmem %s1590_s4, %s973_s26  ;;  %s1544_s13 = scalar_lea.vmem %s1591_s5, %s973_s26 }
  0x32   : > { %v1278_v13 = vld [vmem:[%s1526_s7 + $0x8] sm:$0xff]  }
  0x33   : > { %v1268_v21 = vunpack.c.l.bf16 %v1278_v13 }
  0x34   : > { %739 = vmatpush.bf16.msrb.mxu2 %v1247_v34  ;;  %710 = vmatpush.bf16.msrb.mxu1 %v1239_v35 }
  0x35   : > { %801 = vmatpush.bf16.msrb.mxu0 %v1259_v36 }
  0x38   : > { %740 = vmatpush.bf16.msrb.mxu2 %v1246_v37  ;;  %711 = vmatpush.bf16.msrb.mxu1 %v1238_v38 }
  0x39   : > { %802 = vmatpush.bf16.msrb.mxu0 %v1258_v41 }
  0x3b   : > { %697 = vmatmul.bf16.gmra.mxu1 %v1019_v45 }
  0x3c   : > { %741 = vmatpush.bf16.msrb.mxu2 %v1245_v42  ;;  %712 = vmatpush.bf16.msrb.mxu1 %v1237_v43 }
  0x3d   : > { %779 = vmatmul.bf16.gmra.mxu3 %v1011_v52  ;;  %v1537_v52 = vld [vmem:[%s1589_s3] ss:$0 sm:$0xff] }
  0x3e   : > { %1200 = vmatmul.msk.bf16.vlgmr.msrb.gmra.mxu0 %vm666_vm0, %v995_v51 }
  0x40   : > { %742 = vmatpush.bf16.msrb.mxu2 %v1244_v49  ;;  %713 = vmatpush.bf16.msrb.mxu1 %v1236_v50  ;;  %v1531_v49 = vld [vmem:[%s1588_s2] ss:$0 sm:$0xff] }
  0x41   : > { %v1263_v50 = vld [vmem:[%s1526_s7] sm:$0xff]  }
  0x42   : > { %v1265_v6 = vunpack.c.h.bf16 %v1263_v50 }
  0x44   : > { %743 = vmatpush.bf16.msrb.mxu2 %v1243_v53  ;;  %714 = vmatpush.bf16.msrb.mxu1 %v1235_v54 }
  0x48   : > { %744 = vmatpush.bf16.msrb.mxu2 %v1242_v55  ;;  %715 = vmatpush.bf16.msrb.mxu1 %v1234_v56  ;;  %v1264_v56 = vunpack.c.l.bf16 %v1263_v50 }
  0x4b   : > { %745 = vmatmul.bf16.vlgmr.msrb.gmra.mxu2 %v987_v59  ;;  %716 = vmatmul.bf16.vlgmr.msrb.gmra.mxu1 %v983_v63 }
  0x4d   : > { %784 = vmatmul.bf16.gmra.mxu3 %v1031_v4 }
  0x4e   : > { %1201 = vmatmul.msk.bf16.gmra.mxu0 %vm666_vm0, %v1015_v3 }
  0x5b   : > { %750 = vmatmul.bf16.gmra.mxu2 %v1007_v7  ;;  %721 = vmatmul.bf16.gmra.mxu1 %v1003_v11 }
  0x5d   : > { %789 = vmatmul.bf16.gmra.mxu3 %v1051_v16 }
  0x5e   : > { %1202 = vmatmul.msk.bf16.gmra.mxu0 %vm666_vm0, %v1035_v15 }
  0x6b   : > { %755 = vmatmul.bf16.gmra.mxu2 %v1027_v19  ;;  %726 = vmatmul.bf16.gmra.mxu1 %v1023_v22 }
  0x6e   : > { %1203 = vmatmul.msk.bf16.gmra.mxu0 %vm666_vm0, %v1055_v25 }
  0x7b   : > { %760 = vmatmul.bf16.gmra.mxu2 %v1047_v28  ;;  %731 = vmatmul.bf16.gmra.mxu1 %v1043_v31 }
  0xa8   : > { %v693_v32 = vpop.f32.mrf.mxu1 }
  0xab   : > { %v688_v33 = vpop.f32.mrf.mxu0 }
  0xae   : > { %v1516_v37 = vpop.f32.mrf.mxu2 }
  0xb0   : > { %v695_v34 = vpop.f32.mrf.mxu1  ;;  %v775_v38 = vpop.f32.mrf.mxu3 }
  0xb3   : > { %v690_v35 = vpop.f32.mrf.mxu0 }
  0xb6   : > { %v1520_v41 = vpop.f32.mrf.mxu2 }
  0xb8   : > { %v1514_v36 = vpop.f32.mrf.mxu1  ;;  %v777_v44 = vpop.f32.mrf.mxu3 }
  0xbb   : > { %v804_v40 = vpop.f32.mrf.mxu0 }
  0xc0   : > { %v1518_v39 = vpop.f32.mrf.mxu1  ;;  %v780_v58 = vpop.f32.mrf.mxu3 }
  0xc3   : > { %v806_v46 = vpop.f32.mrf.mxu0 }
  0xc8   : > { %v717_v42 = vpop.f32.mrf.mxu1  ;;  %v782_v10 = vpop.f32.mrf.mxu3 }
  0xc9   : > { %v718_v43 = vadd.f32 %v717_v42, %v688_v33 }
  0xcb   : > { %v809_v61 = vpop.f32.mrf.mxu0 }
  0xce   : > { %v746_v45 = vpop.f32.mrf.mxu2 }
  0xcf   : > { %v747_v47 = vadd.f32 %v746_v45, %v718_v43  ;;  %v1279_v45 = vld [vmem:[%s1526_s7 + $0x10] sm:$0xff]  }
  0xd0   : > { %v719_v53 = vpop.f32.mrf.mxu1  ;;  %v785_v27 = vpop.f32.mrf.mxu3 }
  0xd1   : > { %v776_v48 = vadd.f32 %v775_v38, %v747_v47  ;;  %v720_v54 = vadd.f32 %v719_v53, %v690_v35  ;;  %v1269_v35 = vunpack.c.h.bf16 %v1278_v13 }
  0xd3   : > { %v805_v51 = vadd.f32 %v804_v40, %v776_v48  ;;  %v811_v14 = vpop.f32.mrf.mxu0 }
  0xd5   : > { %v828_v55 = vmul.f32 %v1531_v49, %v805_v51 }
  0xd6   : > { %v748_v57 = vpop.f32.mrf.mxu2 }
  0xd7   : > { %v840_v59 = vadd.f32 %v1537_v52, %v828_v55  ;;  %v749_v60 = vadd.f32 %v748_v57, %v720_v54  ;;  %v1272_v54 = vunpack.c.l.bf16 %v1279_v45 }
  0xd8   : > { %v722_v2 = vpop.f32.mrf.mxu1  ;;  %v787_v50 = vpop.f32.mrf.mxu3 }
  0xd9   : > { %v864_v62 = vadd.f32 %v1264_v56, %v840_v59  ;;  %v778_v63 = vadd.f32 %v777_v44, %v749_v60  ;;  %v723_v3 = vadd.f32 %v722_v2, %v693_v32  ;;  %v1273_v2 = vunpack.c.h.bf16 %v1279_v45 }
  0xdb   : > { %v872_v0 = vmax.f32 %v864_v62, 0.0  ;;  %v807_v1 = vadd.f32 %v806_v46, %v778_v63  ;;  %v814_v31 = vpop.f32.mrf.mxu0 }
  0xdd   : > { %v880_v4 = vpack.c.bf16 %v872_v0, %v872_v0  ;;  %v829_v5 = vmul.f32 %v1531_v49, %v807_v1 }
  0xde   : > { %v751_v7 = vpop.f32.mrf.mxu2 }
  0xdf   : > { %889 = vst.msk [vmem:[%s1544_s13] sm:$0xf] %vm888_vm1, %v880_v4  ;;  %v841_v8 = vadd.f32 %v1537_v52, %v829_v5  ;;  %v752_v9 = vadd.f32 %v751_v7, %v723_v3 }
  0xe0   : > { %v724_v17 = vpop.f32.mrf.mxu1  ;;  %v790_v3 = vpop.f32.mrf.mxu3 }
  0xe1   : > { %v865_v11 = vadd.f32 %v1265_v6, %v841_v8  ;;  %v781_v12 = vadd.f32 %v780_v58, %v752_v9  ;;  %v725_v18 = vadd.f32 %v724_v17, %v695_v34 }
  0xe3   : > { %v873_v15 = vmax.f32 %v865_v11, 0.0  ;;  %v810_v16 = vadd.f32 %v809_v61, %v781_v12  ;;  %v816_v55 = vpop.f32.mrf.mxu0 }
  0xe5   : > { %v881_v19 = vpack.c.bf16 %v873_v15, %v873_v15  ;;  %v830_v20 = vmul.f32 %v1531_v49, %v810_v16 }
  0xe6   : > { %v753_v22 = vpop.f32.mrf.mxu2 }
  0xe7   : > { %890 = vst.msk [vmem:[%s1544_s13 + $0x4] sm:$0xf] %vm888_vm1, %v881_v19  ;;  %v842_v23 = vadd.f32 %v1537_v52, %v830_v20  ;;  %v754_v24 = vadd.f32 %v753_v22, %v725_v18 }
  0xe8   : > { %v727_v30 = vpop.f32.mrf.mxu1  ;;  %v792_v20 = vpop.f32.mrf.mxu3 }
  0xe9   : > { %v866_v25 = vadd.f32 %v1268_v21, %v842_v23  ;;  %v783_v26 = vadd.f32 %v782_v10, %v754_v24  ;;  %v728_v32 = vadd.f32 %v727_v30, %v1514_v36  ;;  %v1280_v10 = vld [vmem:[%s1526_s7 + $0x18] sm:$0xff]  }
  0xea   : > { %v1276_v16 = vunpack.c.l.bf16 %v1280_v10 }
  0xeb   : > { %v874_v28 = vmax.f32 %v866_v25, 0.0  ;;  %v812_v29 = vadd.f32 %v811_v14, %v783_v26  ;;  %v819_v7 = vpop.f32.mrf.mxu0 }
  0xed   : > { %v882_v33 = vpack.c.bf16 %v874_v28, %v874_v28  ;;  %v831_v34 = vmul.f32 %v1531_v49, %v812_v29 }
  0xee   : > { %v756_v38 = vpop.f32.mrf.mxu2 }
  0xef   : > { %891 = vst.msk [vmem:[%s1544_s13 + $0x8] sm:$0xf] %vm888_vm1, %v882_v33  ;;  %v843_v40 = vadd.f32 %v1537_v52, %v831_v34  ;;  %v757_v42 = vadd.f32 %v756_v38, %v728_v32 }
  0xf0   : > { %v729_v48 = vpop.f32.mrf.mxu1 }
  0xf1   : > { %v867_v43 = vadd.f32 %v1269_v35, %v843_v40  ;;  %v786_v44 = vadd.f32 %v785_v27, %v757_v42  ;;  %v730_v36 = vadd.f32 %v729_v48, %v1518_v39  ;;  %v1277_v27 = vunpack.c.h.bf16 %v1280_v10 }
  0xf3   : > { %v875_v46 = vmax.f32 %v867_v43, 0.0  ;;  %v815_v47 = vadd.f32 %v814_v31, %v786_v44  ;;  %v821_v23 = vpop.f32.mrf.mxu0 }
  0xf5   : > { %v883_v51 = vpack.c.bf16 %v875_v46, %v875_v46  ;;  %v832_v53 = vmul.f32 %v1531_v49, %v815_v47 }
  0xf6   : > { %v758_v56 = vpop.f32.mrf.mxu2 }
  0xf7   : > { %892 = vst.msk [vmem:[%s1544_s13 + $0xc] sm:$0xf] %vm888_vm1, %v883_v51  ;;  %v844_v57 = vadd.f32 %v1537_v52, %v832_v53  ;;  %v759_v58 = vadd.f32 %v758_v56, %v730_v36 }
  0xf8   : > { %v732_v63 = vpop.f32.mrf.mxu1 }
  0xf9   : > { %v868_v59 = vadd.f32 %v1272_v54, %v844_v57  ;;  %v788_v60 = vadd.f32 %v787_v50, %v759_v58  ;;  %v733_v39 = vadd.f32 %v732_v63, %v1516_v37 }
  0xfb   : > { %v876_v61 = vmax.f32 %v868_v59, 0.0  ;;  %v817_v62 = vadd.f32 %v816_v55, %v788_v60 }
  0xfd   : > { %v884_v0 = vpack.c.bf16 %v876_v61, %v876_v61  ;;  %v833_v1 = vmul.f32 %v1531_v49, %v817_v62 }
  0xfe   : > { %v761_v4 = vpop.f32.mrf.mxu2 }
  0xff   : > { %893 = vst.msk [vmem:[%s1544_s13 + $0x10] sm:$0xf] %vm888_vm1, %v884_v0  ;;  %v845_v5 = vadd.f32 %v1537_v52, %v833_v1  ;;  %v762_v6 = vadd.f32 %v761_v4, %v733_v39 }
 0x100   : > { %v734_v13 = vpop.f32.mrf.mxu1 }
 0x101   : > { %v869_v8 = vadd.f32 %v1273_v2, %v845_v5  ;;  %v791_v9 = vadd.f32 %v790_v3, %v762_v6  ;;  %v735_v37 = vadd.f32 %v734_v13, %v1520_v41 }
 0x103   : > { %v877_v11 = vmax.f32 %v869_v8, 0.0  ;;  %v820_v12 = vadd.f32 %v819_v7, %v791_v9 }
 0x105   : > { %v885_v14 = vpack.c.bf16 %v877_v11, %v877_v11  ;;  %v834_v15 = vmul.f32 %v1531_v49, %v820_v12 }
 0x106   : > { %v763_v17 = vpop.f32.mrf.mxu2 }
 0x107   : > { %894 = vst.msk [vmem:[%s1544_s13 + $0x14] sm:$0xf] %vm888_vm1, %v885_v14  ;;  %v846_v18 = vadd.f32 %v1537_v52, %v834_v15  ;;  %v764_v19 = vadd.f32 %v763_v17, %v735_v37 }
 0x109   : > { %v870_v21 = vadd.f32 %v1276_v16, %v846_v18  ;;  %v793_v22 = vadd.f32 %v792_v20, %v764_v19 }
 0x10b   : > { %v878_v24 = vmax.f32 %v870_v21, 0.0  ;;  %v822_v25 = vadd.f32 %v821_v23, %v793_v22 }
 0x10d   : > { %v886_v26 = vpack.c.bf16 %v878_v24, %v878_v24  ;;  %v835_v41 = vmul.f32 %v1531_v49, %v822_v25 }
 0x10f   : > { %895 = vst.msk [vmem:[%s1544_s13 + $0x18] sm:$0xf] %vm888_vm1, %v886_v26  ;;  %v847_v28 = vadd.f32 %v1537_v52, %v835_v41 }
 0x111   : > { %v871_v29 = vadd.f32 %v1277_v27, %v847_v28 }
 0x113   : > { %v879_v30 = vmax.f32 %v871_v29, 0.0 }
 0x115   : > { %v887_v31 = vpack.c.bf16 %v879_v30, %v879_v30 }
 0x117   : > { %896 = vst.msk [vmem:[%s1544_s13 + $0x1c] sm:$0xf] %vm888_vm1, %v887_v31 }
 0x118 PF: > { %s15_s18 = sadd.s32 1, %s1314_s18  }
 0x119   : > { %p12_p4 = scmp.ge.s32.totalorder %s15_s18, 4  }
 0x11b   :  { %14 = sbr.rel (!%p12_p4) target bundleno = 1 (0x1), region = 73 }

</bundles_post_ra>
